<compile_context>
chip_gen: v7x
topology: tpu7x:2x2x1
jax: 0.10.0
libtpu: 0.0.40
codegen_flags: <defaults>
</compile_context>

<pallas_src>
import jax
import jax.numpy as jnp
import numpy as np
from jax.experimental import pallas as pl
from jax.experimental.pallas import tpu as pltpu  # noqa: F401  (TPU backend)

# ---- config (stand-ins for FLAGS / env / dataset) ----
VOCAB = 16        # len(dataset.vocab)
WVEC = 16         # FLAGS.wordvec_size
HID = 32          # FLAGS.hidden_size
N_ACTIONS = 8     # env.n_actions
T_IN = 8          # desc_in sequence length
T_OUT = 6         # desc_out sequence length
BATCH = 2
D1, D2, D3 = 4, 4, 8   # world_feats spatial dims  (P = 128, lane-dense output)


# ---------------------------------------------------------------------------
# Single fused kernel: entire Policy.forward
# ---------------------------------------------------------------------------
def policy_kernel(
    # inputs
    desc_in_ref,      # (T*B, V)
    desc_out_ref,     # (T2*B, V)
    state_ref,        # (B, H)
    world_ref,        # (B, H, P)
    embed_w_ref,      # (V, WVEC)
    embed_b_ref,      # (1, WVEC)
    enc_wi_ref,       # (WVEC, 3H)
    enc_wh_ref,       # (H, 3H)
    enc_bi_ref,       # (1, 3H)
    enc_bh_ref,       # (1, 3H)
    bil_w2_ref,       # (H, A*H)   bil_w2[i, a*H+j] = W[a, i, j]
    bil_b_ref,        # (1, A)
    dec_embed_w_ref,  # (V, H)
    dec_embed_b_ref,  # (1, H)
    dec_wi_ref,       # (H, 3H)
    dec_wh_ref,       # (H, 3H)
    dec_bi_ref,       # (1, 3H)
    dec_bh_ref,       # (1, 3H)
    dec_pred_w_ref,   # (H, V)
    dec_pred_b_ref,   # (1, V)
    # outputs
    act_ref,          # (B, A)
    pos_ref,          # (B, P)
    desc_ref,         # (T2*B, V)
):
    B, H = state_ref.shape
    T = desc_in_ref.shape[0] // B
    T2 = desc_out_ref.shape[0] // B
    A = bil_b_ref.shape[1]
    f32 = jnp.float32

    def dot(a, b):
        return jnp.dot(a, b, preferred_element_type=f32)

    def gru_step(gi, h, wh, bh):
        # torch GRU gate order along the fused 3H axis: [r | z | n]
        gh = dot(h, wh) + bh                                   # (B, 3H)
        r = jax.nn.sigmoid(gi[:, :H] + gh[:, :H])
        z = jax.nn.sigmoid(gi[:, H:2 * H] + gh[:, H:2 * H])
        n = jnp.tanh(gi[:, 2 * H:3 * H] + r * gh[:, 2 * H:3 * H])
        return (1.0 - z) * n + z * h

    # ------------------ encoder: emb = Linear(desc_in); _, enc = GRU(emb) ----
    emb = dot(desc_in_ref[...], embed_w_ref[...]) + embed_b_ref[...]    # (T*B, WVEC)
    gi_all = dot(emb, enc_wi_ref[...]) + enc_bi_ref[...]                # (T*B, 3H)
    enc_wh = enc_wh_ref[...]
    enc_bh = enc_bh_ref[...]
    h = jnp.zeros((B, H), f32)
    for t in range(T):                                                  # unrolled
        h = gru_step(gi_all[t * B:(t + 1) * B, :], h, enc_wh, enc_bh)
    enc = h                                                             # (B, H)

    # ------------------ bilinear action head --------------------------------
    # act[b, a] = sum_{i,j} enc[b,i] * W[a,i,j] * sf[b,j] + bias[a]
    sf = state_ref[...]                                                 # (B, H)
    tmp = dot(enc, bil_w2_ref[...])                                     # (B, A*H)
    lane = jax.lax.broadcasted_iota(jnp.int32, (1, A), 1)
    acc = jnp.zeros((B, A), f32)
    for a in range(A):                                                  # unrolled
        col = jnp.sum(tmp[:, a * H:(a + 1) * H] * sf, axis=-1, keepdims=True)
        acc = acc + col * (lane == a).astype(f32)
    act_ref[...] = acc + bil_b_ref[...]

    # ------------------ position head: (world * tile_enc).sum(1) ------------
    for b in range(B):                                                  # unrolled
        pos_ref[b:b + 1, :] = dot(enc[b:b + 1, :], world_ref[b])        # (1, P)

    # ------------------ decoder: GRU(state + enc, embed(desc_out)) ----------
    comb = sf + enc                                                     # (B, H)
    demb = dot(desc_out_ref[...], dec_embed_w_ref[...]) + dec_embed_b_ref[...]  # (T2*B, H)
    gid_all = dot(demb, dec_wi_ref[...]) + dec_bi_ref[...]              # (T2*B, 3H)
    dec_wh = dec_wh_ref[...]
    dec_bh = dec_bh_ref[...]
    pred_w = dec_pred_w_ref[...]
    pred_b = dec_pred_b_ref[...]
    h = comb
    for t in range(T2):                                                 # unrolled
        h = gru_step(gid_all[t * B:(t + 1) * B, :], h, dec_wh, dec_bh)
        desc_ref[t * B:(t + 1) * B, :] = dot(h, pred_w) + pred_b        # (B, V)


# ---------------------------------------------------------------------------
# One-time parameter re-layout (torch layouts -> kernel layouts)
# ---------------------------------------------------------------------------
def prepare_params(p):
    H = HID
    return {
        "embed_w": p["embed_w"].T,                       # (V, WVEC)
        "embed_b": p["embed_b"].reshape(1, -1),
        "enc_wi": p["enc_Wih"].T,                        # (WVEC, 3H)
        "enc_wh": p["enc_Whh"].T,                        # (H, 3H)
        "enc_bi": p["enc_bih"].reshape(1, -1),
        "enc_bh": p["enc_bhh"].reshape(1, -1),
        "bil_w2": jnp.transpose(p["bil_W"], (1, 0, 2)).reshape(H, -1),  # (H, A*H)
        "bil_b": p["bil_b"].reshape(1, -1),
        "dec_embed_w": p["dec_embed_w"].T,               # (V, H)
        "dec_embed_b": p["dec_embed_b"].reshape(1, -1),
        "dec_wi": p["dec_Wih"].T,                        # (H, 3H)
        "dec_wh": p["dec_Whh"].T,                        # (H, 3H)
        "dec_bi": p["dec_bih"].reshape(1, -1),
        "dec_bh": p["dec_bhh"].reshape(1, -1),
        "dec_pred_w": p["dec_pred_w"].T,                 # (H, V)
        "dec_pred_b": p["dec_pred_b"].reshape(1, -1),
    }


# ---------------------------------------------------------------------------
# Policy forward (single fused pallas_call, jitted)
# ---------------------------------------------------------------------------
@jax.jit
def policy_forward_pallas(prep, state_feats, world_feats, desc_in, desc_out):
    T, B, V = desc_in.shape
    T2 = desc_out.shape[0]
    Bw, C, d1, d2, d3 = world_feats.shape
    P = d1 * d2 * d3
    A = prep["bil_b"].shape[1]

    desc_in_flat = desc_in.reshape(T * B, V)
    desc_out_flat = desc_out.reshape(T2 * B, V)
    world_flat = world_feats.reshape(Bw, C, P)

    act_logits, act_pos_logits, desc_flat = pl.pallas_call(
        policy_kernel,
        out_shape=(
            jax.ShapeDtypeStruct((B, A), jnp.float32),
            jax.ShapeDtypeStruct((B, P), jnp.float32),
            jax.ShapeDtypeStruct((T2 * B, V), jnp.float32),
        ),
    )(
        desc_in_flat, desc_out_flat, state_feats, world_flat,
        prep["embed_w"], prep["embed_b"],
        prep["enc_wi"], prep["enc_wh"], prep["enc_bi"], prep["enc_bh"],
        prep["bil_w2"], prep["bil_b"],
        prep["dec_embed_w"], prep["dec_embed_b"],
        prep["dec_wi"], prep["dec_wh"], prep["dec_bi"], prep["dec_bh"],
        prep["dec_pred_w"], prep["dec_pred_b"],
    )

    desc_logits = desc_flat.reshape(T2, B, V)
    return (act_logits, act_pos_logits), desc_logits


# ---------------------------------------------------------------------------
# Pure-JAX reference (mirrors PyTorch semantics) for validation
# ---------------------------------------------------------------------------
def gru_ref(x, h0, w_ih, w_hh, b_ih, b_hh):
    H = h0.shape[-1]

    def step(h, xt):
        gi = xt @ w_ih.T + b_ih
        gh = h @ w_hh.T + b_hh
        r = jax.nn.sigmoid(gi[:, :H] + gh[:, :H])
        z = jax.nn.sigmoid(gi[:, H:2 * H] + gh[:, H:2 * H])
        n = jnp.tanh(gi[:, 2 * H:] + r * gh[:, 2 * H:])
        h_new = (1.0 - z) * n + z * h
        return h_new, h_new

    h_T, reps = jax.lax.scan(step, h0, x)
    return reps, h_T


def policy_forward_ref(p, state_feats, world_feats, desc_in, desc_out):
    emb = desc_in @ p["embed_w"].T + p["embed_b"]
    _, enc = gru_ref(emb, jnp.zeros((desc_in.shape[1], HID), jnp.float32),
                     p["enc_Wih"], p["enc_Whh"], p["enc_bih"], p["enc_bhh"])
    act_logits = jnp.einsum("bi,aij,bj->ba", enc, p["bil_W"], state_feats) + p["bil_b"]
    B, C, d1, d2, d3 = world_feats.shape
    act_pos_logits = jnp.einsum("bhp,bh->bp", world_feats.reshape(B, C, -1), enc)
    comb = state_feats + enc
    demb = desc_out @ p["dec_embed_w"].T + p["dec_embed_b"]
    rep, _ = gru_ref(demb, comb, p["dec_Wih"], p["dec_Whh"], p["dec_bih"], p["dec_bhh"])
    desc_logits = rep @ p["dec_pred_w"].T + p["dec_pred_b"]
    return (act_logits, act_pos_logits), desc_logits


# ---------------------------------------------------------------------------
# Deterministic parameter init (torch layouts: Linear W is (out, in))
# ---------------------------------------------------------------------------
def init_params(key):
    ks = jax.random.split(key, 16)
    s = 0.1
    n = lambda k, shape: s * jax.random.normal(k, shape, jnp.float32)
    return {
        "embed_w": n(ks[0], (WVEC, VOCAB)),
        "embed_b": n(ks[1], (WVEC,)),
        "enc_Wih": n(ks[2], (3 * HID, WVEC)),
        "enc_Whh": n(ks[3], (3 * HID, HID)),
        "enc_bih": n(ks[4], (3 * HID,)),
        "enc_bhh": n(ks[5], (3 * HID,)),
        "bil_W": n(ks[6], (N_ACTIONS, HID, HID)),
        "bil_b": n(ks[7], (N_ACTIONS,)),
        "dec_embed_w": n(ks[8], (HID, VOCAB)),
        "dec_embed_b": n(ks[9], (HID,)),
        "dec_Wih": n(ks[10], (3 * HID, HID)),
        "dec_Whh": n(ks[11], (3 * HID, HID)),
        "dec_bih": n(ks[12], (3 * HID,)),
        "dec_bhh": n(ks[13], (3 * HID,)),
        "dec_pred_w": n(ks[14], (VOCAB, HID)),
        "dec_pred_b": n(ks[15], (VOCAB,)),
    }


if __name__ == "__main__":
    key = jax.random.PRNGKey(0)
    kp, k1, k2, k3, k4 = jax.random.split(key, 5)
    params = init_params(kp)
    prep = prepare_params(params)          # one-time weight re-layout

    state_feats = jax.random.normal(k1, (BATCH, HID), jnp.float32)
    world_feats = jax.random.normal(k2, (BATCH, HID, D1, D2, D3), jnp.float32)
    desc_in = jax.random.normal(k3, (T_IN, BATCH, VOCAB), jnp.float32)
    desc_out = jax.random.normal(k4, (T_OUT, BATCH, VOCAB), jnp.float32)

    (act_logits, act_pos_logits), desc_logits = policy_forward_pallas(
        prep, state_feats, world_feats, desc_in, desc_out)
    jax.block_until_ready((act_logits, act_pos_logits, desc_logits))

    # sanity vs. pure-JAX reference (full-f32 matmuls), tightened tolerance
    with jax.default_matmul_precision("highest"):
        (ra, rp), rd = policy_forward_ref(
            params, state_feats, world_feats, desc_in, desc_out)
        jax.block_until_ready((ra, rp, rd))

    np.testing.assert_allclose(np.asarray(act_logits), np.asarray(ra),
                               rtol=1e-4, atol=1e-4)
    np.testing.assert_allclose(np.asarray(act_pos_logits), np.asarray(rp),
                               rtol=1e-4, atol=1e-4)
    np.testing.assert_allclose(np.asarray(desc_logits), np.asarray(rd),
                               rtol=1e-4, atol=1e-4)

    assert act_logits.shape == (BATCH, N_ACTIONS)
    assert act_pos_logits.shape == (BATCH, D1 * D2 * D3)
    assert desc_logits.shape == (T_OUT, BATCH, VOCAB)

    print("KERNEL_OK")
</pallas_src>

<mosaic_0001>
module attributes {stable_mosaic.version = 11 : i64} {
  func.func @policy_kernel(%arg0: memref<16x16xf32, #tpu.memory_space<vmem>>, %arg1: memref<12x16xf32, #tpu.memory_space<vmem>>, %arg2: memref<2x32xf32, #tpu.memory_space<vmem>>, %arg3: memref<2x32x128xf32, #tpu.memory_space<vmem>>, %arg4: memref<16x16xf32, #tpu.memory_space<vmem>>, %arg5: memref<1x16xf32, #tpu.memory_space<vmem>>, %arg6: memref<16x96xf32, #tpu.memory_space<vmem>>, %arg7: memref<32x96xf32, #tpu.memory_space<vmem>>, %arg8: memref<1x96xf32, #tpu.memory_space<vmem>>, %arg9: memref<1x96xf32, #tpu.memory_space<vmem>>, %arg10: memref<32x256xf32, #tpu.memory_space<vmem>>, %arg11: memref<1x8xf32, #tpu.memory_space<vmem>>, %arg12: memref<16x32xf32, #tpu.memory_space<vmem>>, %arg13: memref<1x32xf32, #tpu.memory_space<vmem>>, %arg14: memref<32x96xf32, #tpu.memory_space<vmem>>, %arg15: memref<32x96xf32, #tpu.memory_space<vmem>>, %arg16: memref<1x96xf32, #tpu.memory_space<vmem>>, %arg17: memref<1x96xf32, #tpu.memory_space<vmem>>, %arg18: memref<32x16xf32, #tpu.memory_space<vmem>>, %arg19: memref<1x16xf32, #tpu.memory_space<vmem>>, %arg20: memref<2x8xf32, #tpu.memory_space<vmem>>, %arg21: memref<2x128xf32, #tpu.memory_space<vmem>>, %arg22: memref<12x16xf32, #tpu.memory_space<vmem>>) attributes {dimension_semantics = [], scalar_prefetch = 0 : i64, scratch_operands = 0 : i64, tpu.core_type = #tpu.core_type<tc>} {
    %c0 = arith.constant 0 : index
    %c0_0 = arith.constant 0 : index
    %0 = vector.load %arg0[%c0, %c0_0] : memref<16x16xf32, #tpu.memory_space<vmem>>, vector<16x16xf32>
    %c0_1 = arith.constant 0 : index
    %c0_2 = arith.constant 0 : index
    %1 = vector.load %arg4[%c0_1, %c0_2] : memref<16x16xf32, #tpu.memory_space<vmem>>, vector<16x16xf32>
    %cst = arith.constant dense<0.000000e+00> : vector<16x16xf32>
    %2 = tpu.matmul %0, %1, %cst {dimension_numbers = #tpu.dot_dimension_numbers<[1], [0], [0], [1], [0, 0, 1, 1], [], []>} : vector<16x16xf32>, vector<16x16xf32>, vector<16x16xf32> -> vector<16x16xf32>
    %c0_3 = arith.constant 0 : index
    %c0_4 = arith.constant 0 : index
    %3 = vector.load %arg5[%c0_3, %c0_4] : memref<1x16xf32, #tpu.memory_space<vmem>>, vector<1x16xf32>
    %4 = vector.broadcast %3 : vector<1x16xf32> to vector<16x16xf32>
    %5 = arith.addf %2, %4 : vector<16x16xf32>
    %c0_5 = arith.constant 0 : index
    %c0_6 = arith.constant 0 : index
    %6 = vector.load %arg6[%c0_5, %c0_6] : memref<16x96xf32, #tpu.memory_space<vmem>>, vector<16x96xf32>
    %cst_7 = arith.constant dense<0.000000e+00> : vector<16x96xf32>
    %7 = tpu.matmul %5, %6, %cst_7 {dimension_numbers = #tpu.dot_dimension_numbers<[1], [0], [0], [1], [0, 0, 1, 1], [], []>} : vector<16x16xf32>, vector<16x96xf32>, vector<16x96xf32> -> vector<16x96xf32>
    %c0_8 = arith.constant 0 : index
    %c0_9 = arith.constant 0 : index
    %8 = vector.load %arg8[%c0_8, %c0_9] : memref<1x96xf32, #tpu.memory_space<vmem>>, vector<1x96xf32>
    %9 = vector.broadcast %8 : vector<1x96xf32> to vector<16x96xf32>
    %10 = arith.addf %7, %9 : vector<16x96xf32>
    %c0_10 = arith.constant 0 : index
    %c0_11 = arith.constant 0 : index
    %11 = vector.load %arg7[%c0_10, %c0_11] : memref<32x96xf32, #tpu.memory_space<vmem>>, vector<32x96xf32>
    %c0_12 = arith.constant 0 : index
    %c0_13 = arith.constant 0 : index
    %12 = vector.load %arg9[%c0_12, %c0_13] : memref<1x96xf32, #tpu.memory_space<vmem>>, vector<1x96xf32>
    %cst_14 = arith.constant 0.000000e+00 : f32
    %13 = vector.broadcast %cst_14 : f32 to vector<2x32xf32>
    %14 = vector.extract_strided_slice %10 {offsets = [0, 0], sizes = [2, 96], strides = [1, 1]} : vector<16x96xf32> to vector<2x96xf32>
    %cst_15 = arith.constant dense<0.000000e+00> : vector<2x96xf32>
    %15 = tpu.matmul %13, %11, %cst_15 {dimension_numbers = #tpu.dot_dimension_numbers<[1], [0], [0], [1], [0, 0, 1, 1], [], []>} : vector<2x32xf32>, vector<32x96xf32>, vector<2x96xf32> -> vector<2x96xf32>
    %16 = vector.broadcast %12 : vector<1x96xf32> to vector<2x96xf32>
    %17 = arith.addf %15, %16 : vector<2x96xf32>
    %18 = vector.extract_strided_slice %14 {offsets = [0, 0], sizes = [2, 32], strides = [1, 1]} : vector<2x96xf32> to vector<2x32xf32>
    %19 = vector.extract_strided_slice %17 {offsets = [0, 0], sizes = [2, 32], strides = [1, 1]} : vector<2x96xf32> to vector<2x32xf32>
    %20 = arith.addf %18, %19 : vector<2x32xf32>
    %21 = arith.negf %20 : vector<2x32xf32>
    %22 = math.exp %21 : vector<2x32xf32>
    %cst_16 = arith.constant 1.000000e+00 : f32
    %23 = vector.broadcast %cst_16 : f32 to vector<2x32xf32>
    %24 = arith.addf %23, %22 : vector<2x32xf32>
    %25 = arith.divf %23, %24 : vector<2x32xf32>
    %26 = vector.extract_strided_slice %14 {offsets = [0, 32], sizes = [2, 32], strides = [1, 1]} : vector<2x96xf32> to vector<2x32xf32>
    %27 = vector.extract_strided_slice %17 {offsets = [0, 32], sizes = [2, 32], strides = [1, 1]} : vector<2x96xf32> to vector<2x32xf32>
    %28 = arith.addf %26, %27 : vector<2x32xf32>
    %29 = arith.negf %28 : vector<2x32xf32>
    %30 = math.exp %29 : vector<2x32xf32>
    %cst_17 = arith.constant 1.000000e+00 : f32
    %31 = vector.broadcast %cst_17 : f32 to vector<2x32xf32>
    %32 = arith.addf %31, %30 : vector<2x32xf32>
    %33 = arith.divf %31, %32 : vector<2x32xf32>
    %34 = vector.extract_strided_slice %14 {offsets = [0, 64], sizes = [2, 32], strides = [1, 1]} : vector<2x96xf32> to vector<2x32xf32>
    %35 = vector.extract_strided_slice %17 {offsets = [0, 64], sizes = [2, 32], strides = [1, 1]} : vector<2x96xf32> to vector<2x32xf32>
    %36 = arith.mulf %25, %35 : vector<2x32xf32>
    %37 = arith.addf %34, %36 : vector<2x32xf32>
    %38 = math.tanh %37 : vector<2x32xf32>
    %cst_18 = arith.constant 1.000000e+00 : f32
    %39 = vector.broadcast %cst_18 : f32 to vector<2x32xf32>
    %40 = arith.subf %39, %33 : vector<2x32xf32>
    %41 = arith.mulf %40, %38 : vector<2x32xf32>
    %42 = arith.mulf %33, %13 : vector<2x32xf32>
    %43 = arith.addf %41, %42 : vector<2x32xf32>
    %44 = vector.extract_strided_slice %10 {offsets = [2, 0], sizes = [2, 96], strides = [1, 1]} : vector<16x96xf32> to vector<2x96xf32>
    %cst_19 = arith.constant dense<0.000000e+00> : vector<2x96xf32>
    %45 = tpu.matmul %43, %11, %cst_19 {dimension_numbers = #tpu.dot_dimension_numbers<[1], [0], [0], [1], [0, 0, 1, 1], [], []>} : vector<2x32xf32>, vector<32x96xf32>, vector<2x96xf32> -> vector<2x96xf32>
    %46 = vector.broadcast %12 : vector<1x96xf32> to vector<2x96xf32>
    %47 = arith.addf %45, %46 : vector<2x96xf32>
    %48 = vector.extract_strided_slice %44 {offsets = [0, 0], sizes = [2, 32], strides = [1, 1]} : vector<2x96xf32> to vector<2x32xf32>
    %49 = vector.extract_strided_slice %47 {offsets = [0, 0], sizes = [2, 32], strides = [1, 1]} : vector<2x96xf32> to vector<2x32xf32>
    %50 = arith.addf %48, %49 : vector<2x32xf32>
    %51 = arith.negf %50 : vector<2x32xf32>
    %52 = math.exp %51 : vector<2x32xf32>
    %cst_20 = arith.constant 1.000000e+00 : f32
    %53 = vector.broadcast %cst_20 : f32 to vector<2x32xf32>
    %54 = arith.addf %53, %52 : vector<2x32xf32>
    %55 = arith.divf %53, %54 : vector<2x32xf32>
    %56 = vector.extract_strided_slice %44 {offsets = [0, 32], sizes = [2, 32], strides = [1, 1]} : vector<2x96xf32> to vector<2x32xf32>
    %57 = vector.extract_strided_slice %47 {offsets = [0, 32], sizes = [2, 32], strides = [1, 1]} : vector<2x96xf32> to vector<2x32xf32>
    %58 = arith.addf %56, %57 : vector<2x32xf32>
    %59 = arith.negf %58 : vector<2x32xf32>
    %60 = math.exp %59 : vector<2x32xf32>
    %cst_21 = arith.constant 1.000000e+00 : f32
    %61 = vector.broadcast %cst_21 : f32 to vector<2x32xf32>
    %62 = arith.addf %61, %60 : vector<2x32xf32>
    %63 = arith.divf %61, %62 : vector<2x32xf32>
    %64 = vector.extract_strided_slice %44 {offsets = [0, 64], sizes = [2, 32], strides = [1, 1]} : vector<2x96xf32> to vector<2x32xf32>
    %65 = vector.extract_strided_slice %47 {offsets = [0, 64], sizes = [2, 32], strides = [1, 1]} : vector<2x96xf32> to vector<2x32xf32>
    %66 = arith.mulf %55, %65 : vector<2x32xf32>
    %67 = arith.addf %64, %66 : vector<2x32xf32>
    %68 = math.tanh %67 : vector<2x32xf32>
    %cst_22 = arith.constant 1.000000e+00 : f32
    %69 = vector.broadcast %cst_22 : f32 to vector<2x32xf32>
    %70 = arith.subf %69, %63 : vector<2x32xf32>
    %71 = arith.mulf %70, %68 : vector<2x32xf32>
    %72 = arith.mulf %63, %43 : vector<2x32xf32>
    %73 = arith.addf %71, %72 : vector<2x32xf32>
    %74 = vector.extract_strided_slice %10 {offsets = [4, 0], sizes = [2, 96], strides = [1, 1]} : vector<16x96xf32> to vector<2x96xf32>
    %cst_23 = arith.constant dense<0.000000e+00> : vector<2x96xf32>
    %75 = tpu.matmul %73, %11, %cst_23 {dimension_numbers = #tpu.dot_dimension_numbers<[1], [0], [0], [1], [0, 0, 1, 1], [], []>} : vector<2x32xf32>, vector<32x96xf32>, vector<2x96xf32> -> vector<2x96xf32>
    %76 = vector.broadcast %12 : vector<1x96xf32> to vector<2x96xf32>
    %77 = arith.addf %75, %76 : vector<2x96xf32>
    %78 = vector.extract_strided_slice %74 {offsets = [0, 0], sizes = [2, 32], strides = [1, 1]} : vector<2x96xf32> to vector<2x32xf32>
    %79 = vector.extract_strided_slice %77 {offsets = [0, 0], sizes = [2, 32], strides = [1, 1]} : vector<2x96xf32> to vector<2x32xf32>
    %80 = arith.addf %78, %79 : vector<2x32xf32>
    %81 = arith.negf %80 : vector<2x32xf32>
    %82 = math.exp %81 : vector<2x32xf32>
    %cst_24 = arith.constant 1.000000e+00 : f32
    %83 = vector.broadcast %cst_24 : f32 to vector<2x32xf32>
    %84 = arith.addf %83, %82 : vector<2x32xf32>
    %85 = arith.divf %83, %84 : vector<2x32xf32>
    %86 = vector.extract_strided_slice %74 {offsets = [0, 32], sizes = [2, 32], strides = [1, 1]} : vector<2x96xf32> to vector<2x32xf32>
    %87 = vector.extract_strided_slice %77 {offsets = [0, 32], sizes = [2, 32], strides = [1, 1]} : vector<2x96xf32> to vector<2x32xf32>
    %88 = arith.addf %86, %87 : vector<2x32xf32>
    %89 = arith.negf %88 : vector<2x32xf32>
    %90 = math.exp %89 : vector<2x32xf32>
    %cst_25 = arith.constant 1.000000e+00 : f32
    %91 = vector.broadcast %cst_25 : f32 to vector<2x32xf32>
    %92 = arith.addf %91, %90 : vector<2x32xf32>
    %93 = arith.divf %91, %92 : vector<2x32xf32>
    %94 = vector.extract_strided_slice %74 {offsets = [0, 64], sizes = [2, 32], strides = [1, 1]} : vector<2x96xf32> to vector<2x32xf32>
    %95 = vector.extract_strided_slice %77 {offsets = [0, 64], sizes = [2, 32], strides = [1, 1]} : vector<2x96xf32> to vector<2x32xf32>
    %96 = arith.mulf %85, %95 : vector<2x32xf32>
    %97 = arith.addf %94, %96 : vector<2x32xf32>
    %98 = math.tanh %97 : vector<2x32xf32>
    %cst_26 = arith.constant 1.000000e+00 : f32
    %99 = vector.broadcast %cst_26 : f32 to vector<2x32xf32>
    %100 = arith.subf %99, %93 : vector<2x32xf32>
    %101 = arith.mulf %100, %98 : vector<2x32xf32>
    %102 = arith.mulf %93, %73 : vector<2x32xf32>
    %103 = arith.addf %101, %102 : vector<2x32xf32>
    %104 = vector.extract_strided_slice %10 {offsets = [6, 0], sizes = [2, 96], strides = [1, 1]} : vector<16x96xf32> to vector<2x96xf32>
    %cst_27 = arith.constant dense<0.000000e+00> : vector<2x96xf32>
    %105 = tpu.matmul %103, %11, %cst_27 {dimension_numbers = #tpu.dot_dimension_numbers<[1], [0], [0], [1], [0, 0, 1, 1], [], []>} : vector<2x32xf32>, vector<32x96xf32>, vector<2x96xf32> -> vector<2x96xf32>
    %106 = vector.broadcast %12 : vector<1x96xf32> to vector<2x96xf32>
    %107 = arith.addf %105, %106 : vector<2x96xf32>
    %108 = vector.extract_strided_slice %104 {offsets = [0, 0], sizes = [2, 32], strides = [1, 1]} : vector<2x96xf32> to vector<2x32xf32>
    %109 = vector.extract_strided_slice %107 {offsets = [0, 0], sizes = [2, 32], strides = [1, 1]} : vector<2x96xf32> to vector<2x32xf32>
    %110 = arith.addf %108, %109 : vector<2x32xf32>
    %111 = arith.negf %110 : vector<2x32xf32>
    %112 = math.exp %111 : vector<2x32xf32>
    %cst_28 = arith.constant 1.000000e+00 : f32
    %113 = vector.broadcast %cst_28 : f32 to vector<2x32xf32>
    %114 = arith.addf %113, %112 : vector<2x32xf32>
    %115 = arith.divf %113, %114 : vector<2x32xf32>
    %116 = vector.extract_strided_slice %104 {offsets = [0, 32], sizes = [2, 32], strides = [1, 1]} : vector<2x96xf32> to vector<2x32xf32>
    %117 = vector.extract_strided_slice %107 {offsets = [0, 32], sizes = [2, 32], strides = [1, 1]} : vector<2x96xf32> to vector<2x32xf32>
    %118 = arith.addf %116, %117 : vector<2x32xf32>
    %119 = arith.negf %118 : vector<2x32xf32>
    %120 = math.exp %119 : vector<2x32xf32>
    %cst_29 = arith.constant 1.000000e+00 : f32
    %121 = vector.broadcast %cst_29 : f32 to vector<2x32xf32>
    %122 = arith.addf %121, %120 : vector<2x32xf32>
    %123 = arith.divf %121, %122 : vector<2x32xf32>
    %124 = vector.extract_strided_slice %104 {offsets = [0, 64], sizes = [2, 32], strides = [1, 1]} : vector<2x96xf32> to vector<2x32xf32>
    %125 = vector.extract_strided_slice %107 {offsets = [0, 64], sizes = [2, 32], strides = [1, 1]} : vector<2x96xf32> to vector<2x32xf32>
    %126 = arith.mulf %115, %125 : vector<2x32xf32>
    %127 = arith.addf %124, %126 : vector<2x32xf32>
    %128 = math.tanh %127 : vector<2x32xf32>
    %cst_30 = arith.constant 1.000000e+00 : f32
    %129 = vector.broadcast %cst_30 : f32 to vector<2x32xf32>
    %130 = arith.subf %129, %123 : vector<2x32xf32>
    %131 = arith.mulf %130, %128 : vector<2x32xf32>
    %132 = arith.mulf %123, %103 : vector<2x32xf32>
    %133 = arith.addf %131, %132 : vector<2x32xf32>
    %134 = vector.extract_strided_slice %10 {offsets = [8, 0], sizes = [2, 96], strides = [1, 1]} : vector<16x96xf32> to vector<2x96xf32>
    %cst_31 = arith.constant dense<0.000000e+00> : vector<2x96xf32>
    %135 = tpu.matmul %133, %11, %cst_31 {dimension_numbers = #tpu.dot_dimension_numbers<[1], [0], [0], [1], [0, 0, 1, 1], [], []>} : vector<2x32xf32>, vector<32x96xf32>, vector<2x96xf32> -> vector<2x96xf32>
    %136 = vector.broadcast %12 : vector<1x96xf32> to vector<2x96xf32>
    %137 = arith.addf %135, %136 : vector<2x96xf32>
    %138 = vector.extract_strided_slice %134 {offsets = [0, 0], sizes = [2, 32], strides = [1, 1]} : vector<2x96xf32> to vector<2x32xf32>
    %139 = vector.extract_strided_slice %137 {offsets = [0, 0], sizes = [2, 32], strides = [1, 1]} : vector<2x96xf32> to vector<2x32xf32>
    %140 = arith.addf %138, %139 : vector<2x32xf32>
    %141 = arith.negf %140 : vector<2x32xf32>
    %142 = math.exp %141 : vector<2x32xf32>
    %cst_32 = arith.constant 1.000000e+00 : f32
    %143 = vector.broadcast %cst_32 : f32 to vector<2x32xf32>
    %144 = arith.addf %143, %142 : vector<2x32xf32>
    %145 = arith.divf %143, %144 : vector<2x32xf32>
    %146 = vector.extract_strided_slice %134 {offsets = [0, 32], sizes = [2, 32], strides = [1, 1]} : vector<2x96xf32> to vector<2x32xf32>
    %147 = vector.extract_strided_slice %137 {offsets = [0, 32], sizes = [2, 32], strides = [1, 1]} : vector<2x96xf32> to vector<2x32xf32>
    %148 = arith.addf %146, %147 : vector<2x32xf32>
    %149 = arith.negf %148 : vector<2x32xf32>
    %150 = math.exp %149 : vector<2x32xf32>
    %cst_33 = arith.constant 1.000000e+00 : f32
    %151 = vector.broadcast %cst_33 : f32 to vector<2x32xf32>
    %152 = arith.addf %151, %150 : vector<2x32xf32>
    %153 = arith.divf %151, %152 : vector<2x32xf32>
    %154 = vector.extract_strided_slice %134 {offsets = [0, 64], sizes = [2, 32], strides = [1, 1]} : vector<2x96xf32> to vector<2x32xf32>
    %155 = vector.extract_strided_slice %137 {offsets = [0, 64], sizes = [2, 32], strides = [1, 1]} : vector<2x96xf32> to vector<2x32xf32>
    %156 = arith.mulf %145, %155 : vector<2x32xf32>
    %157 = arith.addf %154, %156 : vector<2x32xf32>
    %158 = math.tanh %157 : vector<2x32xf32>
    %cst_34 = arith.constant 1.000000e+00 : f32
    %159 = vector.broadcast %cst_34 : f32 to vector<2x32xf32>
    %160 = arith.subf %159, %153 : vector<2x32xf32>
    %161 = arith.mulf %160, %158 : vector<2x32xf32>
    %162 = arith.mulf %153, %133 : vector<2x32xf32>
    %163 = arith.addf %161, %162 : vector<2x32xf32>
    %164 = vector.extract_strided_slice %10 {offsets = [10, 0], sizes = [2, 96], strides = [1, 1]} : vector<16x96xf32> to vector<2x96xf32>
    %cst_35 = arith.constant dense<0.000000e+00> : vector<2x96xf32>
    %165 = tpu.matmul %163, %11, %cst_35 {dimension_numbers = #tpu.dot_dimension_numbers<[1], [0], [0], [1], [0, 0, 1, 1], [], []>} : vector<2x32xf32>, vector<32x96xf32>, vector<2x96xf32> -> vector<2x96xf32>
    %166 = vector.broadcast %12 : vector<1x96xf32> to vector<2x96xf32>
    %167 = arith.addf %165, %166 : vector<2x96xf32>
    %168 = vector.extract_strided_slice %164 {offsets = [0, 0], sizes = [2, 32], strides = [1, 1]} : vector<2x96xf32> to vector<2x32xf32>
    %169 = vector.extract_strided_slice %167 {offsets = [0, 0], sizes = [2, 32], strides = [1, 1]} : vector<2x96xf32> to vector<2x32xf32>
    %170 = arith.addf %168, %169 : vector<2x32xf32>
    %171 = arith.negf %170 : vector<2x32xf32>
    %172 = math.exp %171 : vector<2x32xf32>
    %cst_36 = arith.constant 1.000000e+00 : f32
    %173 = vector.broadcast %cst_36 : f32 to vector<2x32xf32>
    %174 = arith.addf %173, %172 : vector<2x32xf32>
    %175 = arith.divf %173, %174 : vector<2x32xf32>
    %176 = vector.extract_strided_slice %164 {offsets = [0, 32], sizes = [2, 32], strides = [1, 1]} : vector<2x96xf32> to vector<2x32xf32>
    %177 = vector.extract_strided_slice %167 {offsets = [0, 32], sizes = [2, 32], strides = [1, 1]} : vector<2x96xf32> to vector<2x32xf32>
    %178 = arith.addf %176, %177 : vector<2x32xf32>
    %179 = arith.negf %178 : vector<2x32xf32>
    %180 = math.exp %179 : vector<2x32xf32>
    %cst_37 = arith.constant 1.000000e+00 : f32
    %181 = vector.broadcast %cst_37 : f32 to vector<2x32xf32>
    %182 = arith.addf %181, %180 : vector<2x32xf32>
    %183 = arith.divf %181, %182 : vector<2x32xf32>
    %184 = vector.extract_strided_slice %164 {offsets = [0, 64], sizes = [2, 32], strides = [1, 1]} : vector<2x96xf32> to vector<2x32xf32>
    %185 = vector.extract_strided_slice %167 {offsets = [0, 64], sizes = [2, 32], strides = [1, 1]} : vector<2x96xf32> to vector<2x32xf32>
    %186 = arith.mulf %175, %185 : vector<2x32xf32>
    %187 = arith.addf %184, %186 : vector<2x32xf32>
    %188 = math.tanh %187 : vector<2x32xf32>
    %cst_38 = arith.constant 1.000000e+00 : f32
    %189 = vector.broadcast %cst_38 : f32 to vector<2x32xf32>
    %190 = arith.subf %189, %183 : vector<2x32xf32>
    %191 = arith.mulf %190, %188 : vector<2x32xf32>
    %192 = arith.mulf %183, %163 : vector<2x32xf32>
    %193 = arith.addf %191, %192 : vector<2x32xf32>
    %194 = vector.extract_strided_slice %10 {offsets = [12, 0], sizes = [2, 96], strides = [1, 1]} : vector<16x96xf32> to vector<2x96xf32>
    %cst_39 = arith.constant dense<0.000000e+00> : vector<2x96xf32>
    %195 = tpu.matmul %193, %11, %cst_39 {dimension_numbers = #tpu.dot_dimension_numbers<[1], [0], [0], [1], [0, 0, 1, 1], [], []>} : vector<2x32xf32>, vector<32x96xf32>, vector<2x96xf32> -> vector<2x96xf32>
    %196 = vector.broadcast %12 : vector<1x96xf32> to vector<2x96xf32>
    %197 = arith.addf %195, %196 : vector<2x96xf32>
    %198 = vector.extract_strided_slice %194 {offsets = [0, 0], sizes = [2, 32], strides = [1, 1]} : vector<2x96xf32> to vector<2x32xf32>
    %199 = vector.extract_strided_slice %197 {offsets = [0, 0], sizes = [2, 32], strides = [1, 1]} : vector<2x96xf32> to vector<2x32xf32>
    %200 = arith.addf %198, %199 : vector<2x32xf32>
    %201 = arith.negf %200 : vector<2x32xf32>
    %202 = math.exp %201 : vector<2x32xf32>
    %cst_40 = arith.constant 1.000000e+00 : f32
    %203 = vector.broadcast %cst_40 : f32 to vector<2x32xf32>
    %204 = arith.addf %203, %202 : vector<2x32xf32>
    %205 = arith.divf %203, %204 : vector<2x32xf32>
    %206 = vector.extract_strided_slice %194 {offsets = [0, 32], sizes = [2, 32], strides = [1, 1]} : vector<2x96xf32> to vector<2x32xf32>
    %207 = vector.extract_strided_slice %197 {offsets = [0, 32], sizes = [2, 32], strides = [1, 1]} : vector<2x96xf32> to vector<2x32xf32>
    %208 = arith.addf %206, %207 : vector<2x32xf32>
    %209 = arith.negf %208 : vector<2x32xf32>
    %210 = math.exp %209 : vector<2x32xf32>
    %cst_41 = arith.constant 1.000000e+00 : f32
    %211 = vector.broadcast %cst_41 : f32 to vector<2x32xf32>
    %212 = arith.addf %211, %210 : vector<2x32xf32>
    %213 = arith.divf %211, %212 : vector<2x32xf32>
    %214 = vector.extract_strided_slice %194 {offsets = [0, 64], sizes = [2, 32], strides = [1, 1]} : vector<2x96xf32> to vector<2x32xf32>
    %215 = vector.extract_strided_slice %197 {offsets = [0, 64], sizes = [2, 32], strides = [1, 1]} : vector<2x96xf32> to vector<2x32xf32>
    %216 = arith.mulf %205, %215 : vector<2x32xf32>
    %217 = arith.addf %214, %216 : vector<2x32xf32>
    %218 = math.tanh %217 : vector<2x32xf32>
    %cst_42 = arith.constant 1.000000e+00 : f32
    %219 = vector.broadcast %cst_42 : f32 to vector<2x32xf32>
    %220 = arith.subf %219, %213 : vector<2x32xf32>
    %221 = arith.mulf %220, %218 : vector<2x32xf32>
    %222 = arith.mulf %213, %193 : vector<2x32xf32>
    %223 = arith.addf %221, %222 : vector<2x32xf32>
    %224 = vector.extract_strided_slice %10 {offsets = [14, 0], sizes = [2, 96], strides = [1, 1]} : vector<16x96xf32> to vector<2x96xf32>
    %cst_43 = arith.constant dense<0.000000e+00> : vector<2x96xf32>
    %225 = tpu.matmul %223, %11, %cst_43 {dimension_numbers = #tpu.dot_dimension_numbers<[1], [0], [0], [1], [0, 0, 1, 1], [], []>} : vector<2x32xf32>, vector<32x96xf32>, vector<2x96xf32> -> vector<2x96xf32>
    %226 = vector.broadcast %12 : vector<1x96xf32> to vector<2x96xf32>
    %227 = arith.addf %225, %226 : vector<2x96xf32>
    %228 = vector.extract_strided_slice %224 {offsets = [0, 0], sizes = [2, 32], strides = [1, 1]} : vector<2x96xf32> to vector<2x32xf32>
    %229 = vector.extract_strided_slice %227 {offsets = [0, 0], sizes = [2, 32], strides = [1, 1]} : vector<2x96xf32> to vector<2x32xf32>
    %230 = arith.addf %228, %229 : vector<2x32xf32>
    %231 = arith.negf %230 : vector<2x32xf32>
    %232 = math.exp %231 : vector<2x32xf32>
    %cst_44 = arith.constant 1.000000e+00 : f32
    %233 = vector.broadcast %cst_44 : f32 to vector<2x32xf32>
    %234 = arith.addf %233, %232 : vector<2x32xf32>
    %235 = arith.divf %233, %234 : vector<2x32xf32>
    %236 = vector.extract_strided_slice %224 {offsets = [0, 32], sizes = [2, 32], strides = [1, 1]} : vector<2x96xf32> to vector<2x32xf32>
    %237 = vector.extract_strided_slice %227 {offsets = [0, 32], sizes = [2, 32], strides = [1, 1]} : vector<2x96xf32> to vector<2x32xf32>
    %238 = arith.addf %236, %237 : vector<2x32xf32>
    %239 = arith.negf %238 : vector<2x32xf32>
    %240 = math.exp %239 : vector<2x32xf32>
    %cst_45 = arith.constant 1.000000e+00 : f32
    %241 = vector.broadcast %cst_45 : f32 to vector<2x32xf32>
    %242 = arith.addf %241, %240 : vector<2x32xf32>
    %243 = arith.divf %241, %242 : vector<2x32xf32>
    %244 = vector.extract_strided_slice %224 {offsets = [0, 64], sizes = [2, 32], strides = [1, 1]} : vector<2x96xf32> to vector<2x32xf32>
    %245 = vector.extract_strided_slice %227 {offsets = [0, 64], sizes = [2, 32], strides = [1, 1]} : vector<2x96xf32> to vector<2x32xf32>
    %246 = arith.mulf %235, %245 : vector<2x32xf32>
    %247 = arith.addf %244, %246 : vector<2x32xf32>
    %248 = math.tanh %247 : vector<2x32xf32>
    %cst_46 = arith.constant 1.000000e+00 : f32
    %249 = vector.broadcast %cst_46 : f32 to vector<2x32xf32>
    %250 = arith.subf %249, %243 : vector<2x32xf32>
    %251 = arith.mulf %250, %248 : vector<2x32xf32>
    %252 = arith.mulf %243, %223 : vector<2x32xf32>
    %253 = arith.addf %251, %252 : vector<2x32xf32>
    %c0_47 = arith.constant 0 : index
    %c0_48 = arith.constant 0 : index
    %254 = vector.load %arg2[%c0_47, %c0_48] : memref<2x32xf32, #tpu.memory_space<vmem>>, vector<2x32xf32>
    %c0_49 = arith.constant 0 : index
    %c0_50 = arith.constant 0 : index
    %255 = vector.load %arg10[%c0_49, %c0_50] : memref<32x256xf32, #tpu.memory_space<vmem>>, vector<32x256xf32>
    %cst_51 = arith.constant dense<0.000000e+00> : vector<2x256xf32>
    %256 = tpu.matmul %253, %255, %cst_51 {dimension_numbers = #tpu.dot_dimension_numbers<[1], [0], [0], [1], [0, 0, 1, 1], [], []>} : vector<2x32xf32>, vector<32x256xf32>, vector<2x256xf32> -> vector<2x256xf32>
    %257 = tpu.iota {dimensions = array<i32: 1>} : vector<1x8xi32>
    %cst_52 = arith.constant 0.000000e+00 : f32
    %258 = vector.broadcast %cst_52 : f32 to vector<2x8xf32>
    %259 = vector.extract_strided_slice %256 {offsets = [0, 0], sizes = [2, 32], strides = [1, 1]} : vector<2x256xf32> to vector<2x32xf32>
    %260 = arith.mulf %259, %254 : vector<2x32xf32>
    %cst_53 = arith.constant dense<0.000000e+00> : vector<2xf32>
    %261 = vector.multi_reduction <add>, %260, %cst_53 [1] : vector<2x32xf32> to vector<2xf32>
    %262 = vector.shape_cast %261 : vector<2xf32> to vector<2x1xf32>
    %c0_i32 = arith.constant 0 : i32
    %263 = vector.broadcast %c0_i32 : i32 to vector<1x8xi32>
    %264 = arith.cmpi eq, %257, %263 : vector<1x8xi32>
    %265 = arith.extui %264 : vector<1x8xi1> to vector<1x8xi32>
    %266 = arith.sitofp %265 : vector<1x8xi32> to vector<1x8xf32>
    %267 = vector.broadcast %262 : vector<2x1xf32> to vector<2x8xf32>
    %268 = vector.broadcast %266 : vector<1x8xf32> to vector<2x8xf32>
    %269 = arith.mulf %267, %268 : vector<2x8xf32>
    %270 = arith.addf %258, %269 : vector<2x8xf32>
    %271 = vector.extract_strided_slice %256 {offsets = [0, 32], sizes = [2, 32], strides = [1, 1]} : vector<2x256xf32> to vector<2x32xf32>
    %272 = arith.mulf %271, %254 : vector<2x32xf32>
    %cst_54 = arith.constant dense<0.000000e+00> : vector<2xf32>
    %273 = vector.multi_reduction <add>, %272, %cst_54 [1] : vector<2x32xf32> to vector<2xf32>
    %274 = vector.shape_cast %273 : vector<2xf32> to vector<2x1xf32>
    %c1_i32 = arith.constant 1 : i32
    %275 = vector.broadcast %c1_i32 : i32 to vector<1x8xi32>
    %276 = arith.cmpi eq, %257, %275 : vector<1x8xi32>
    %277 = arith.extui %276 : vector<1x8xi1> to vector<1x8xi32>
    %278 = arith.sitofp %277 : vector<1x8xi32> to vector<1x8xf32>
    %279 = vector.broadcast %274 : vector<2x1xf32> to vector<2x8xf32>
    %280 = vector.broadcast %278 : vector<1x8xf32> to vector<2x8xf32>
    %281 = arith.mulf %279, %280 : vector<2x8xf32>
    %282 = arith.addf %270, %281 : vector<2x8xf32>
    %283 = vector.extract_strided_slice %256 {offsets = [0, 64], sizes = [2, 32], strides = [1, 1]} : vector<2x256xf32> to vector<2x32xf32>
    %284 = arith.mulf %283, %254 : vector<2x32xf32>
    %cst_55 = arith.constant dense<0.000000e+00> : vector<2xf32>
    %285 = vector.multi_reduction <add>, %284, %cst_55 [1] : vector<2x32xf32> to vector<2xf32>
    %286 = vector.shape_cast %285 : vector<2xf32> to vector<2x1xf32>
    %c2_i32 = arith.constant 2 : i32
    %287 = vector.broadcast %c2_i32 : i32 to vector<1x8xi32>
    %288 = arith.cmpi eq, %257, %287 : vector<1x8xi32>
    %289 = arith.extui %288 : vector<1x8xi1> to vector<1x8xi32>
    %290 = arith.sitofp %289 : vector<1x8xi32> to vector<1x8xf32>
    %291 = vector.broadcast %286 : vector<2x1xf32> to vector<2x8xf32>
    %292 = vector.broadcast %290 : vector<1x8xf32> to vector<2x8xf32>
    %293 = arith.mulf %291, %292 : vector<2x8xf32>
    %294 = arith.addf %282, %293 : vector<2x8xf32>
    %295 = vector.extract_strided_slice %256 {offsets = [0, 96], sizes = [2, 32], strides = [1, 1]} : vector<2x256xf32> to vector<2x32xf32>
    %296 = arith.mulf %295, %254 : vector<2x32xf32>
    %cst_56 = arith.constant dense<0.000000e+00> : vector<2xf32>
    %297 = vector.multi_reduction <add>, %296, %cst_56 [1] : vector<2x32xf32> to vector<2xf32>
    %298 = vector.shape_cast %297 : vector<2xf32> to vector<2x1xf32>
    %c3_i32 = arith.constant 3 : i32
    %299 = vector.broadcast %c3_i32 : i32 to vector<1x8xi32>
    %300 = arith.cmpi eq, %257, %299 : vector<1x8xi32>
    %301 = arith.extui %300 : vector<1x8xi1> to vector<1x8xi32>
    %302 = arith.sitofp %301 : vector<1x8xi32> to vector<1x8xf32>
    %303 = vector.broadcast %298 : vector<2x1xf32> to vector<2x8xf32>
    %304 = vector.broadcast %302 : vector<1x8xf32> to vector<2x8xf32>
    %305 = arith.mulf %303, %304 : vector<2x8xf32>
    %306 = arith.addf %294, %305 : vector<2x8xf32>
    %307 = vector.extract_strided_slice %256 {offsets = [0, 128], sizes = [2, 32], strides = [1, 1]} : vector<2x256xf32> to vector<2x32xf32>
    %308 = arith.mulf %307, %254 : vector<2x32xf32>
    %cst_57 = arith.constant dense<0.000000e+00> : vector<2xf32>
    %309 = vector.multi_reduction <add>, %308, %cst_57 [1] : vector<2x32xf32> to vector<2xf32>
    %310 = vector.shape_cast %309 : vector<2xf32> to vector<2x1xf32>
    %c4_i32 = arith.constant 4 : i32
    %311 = vector.broadcast %c4_i32 : i32 to vector<1x8xi32>
    %312 = arith.cmpi eq, %257, %311 : vector<1x8xi32>
    %313 = arith.extui %312 : vector<1x8xi1> to vector<1x8xi32>
    %314 = arith.sitofp %313 : vector<1x8xi32> to vector<1x8xf32>
    %315 = vector.broadcast %310 : vector<2x1xf32> to vector<2x8xf32>
    %316 = vector.broadcast %314 : vector<1x8xf32> to vector<2x8xf32>
    %317 = arith.mulf %315, %316 : vector<2x8xf32>
    %318 = arith.addf %306, %317 : vector<2x8xf32>
    %319 = vector.extract_strided_slice %256 {offsets = [0, 160], sizes = [2, 32], strides = [1, 1]} : vector<2x256xf32> to vector<2x32xf32>
    %320 = arith.mulf %319, %254 : vector<2x32xf32>
    %cst_58 = arith.constant dense<0.000000e+00> : vector<2xf32>
    %321 = vector.multi_reduction <add>, %320, %cst_58 [1] : vector<2x32xf32> to vector<2xf32>
    %322 = vector.shape_cast %321 : vector<2xf32> to vector<2x1xf32>
    %c5_i32 = arith.constant 5 : i32
    %323 = vector.broadcast %c5_i32 : i32 to vector<1x8xi32>
    %324 = arith.cmpi eq, %257, %323 : vector<1x8xi32>
    %325 = arith.extui %324 : vector<1x8xi1> to vector<1x8xi32>
    %326 = arith.sitofp %325 : vector<1x8xi32> to vector<1x8xf32>
    %327 = vector.broadcast %322 : vector<2x1xf32> to vector<2x8xf32>
    %328 = vector.broadcast %326 : vector<1x8xf32> to vector<2x8xf32>
    %329 = arith.mulf %327, %328 : vector<2x8xf32>
    %330 = arith.addf %318, %329 : vector<2x8xf32>
    %331 = vector.extract_strided_slice %256 {offsets = [0, 192], sizes = [2, 32], strides = [1, 1]} : vector<2x256xf32> to vector<2x32xf32>
    %332 = arith.mulf %331, %254 : vector<2x32xf32>
    %cst_59 = arith.constant dense<0.000000e+00> : vector<2xf32>
    %333 = vector.multi_reduction <add>, %332, %cst_59 [1] : vector<2x32xf32> to vector<2xf32>
    %334 = vector.shape_cast %333 : vector<2xf32> to vector<2x1xf32>
    %c6_i32 = arith.constant 6 : i32
    %335 = vector.broadcast %c6_i32 : i32 to vector<1x8xi32>
    %336 = arith.cmpi eq, %257, %335 : vector<1x8xi32>
    %337 = arith.extui %336 : vector<1x8xi1> to vector<1x8xi32>
    %338 = arith.sitofp %337 : vector<1x8xi32> to vector<1x8xf32>
    %339 = vector.broadcast %334 : vector<2x1xf32> to vector<2x8xf32>
    %340 = vector.broadcast %338 : vector<1x8xf32> to vector<2x8xf32>
    %341 = arith.mulf %339, %340 : vector<2x8xf32>
    %342 = arith.addf %330, %341 : vector<2x8xf32>
    %343 = vector.extract_strided_slice %256 {offsets = [0, 224], sizes = [2, 32], strides = [1, 1]} : vector<2x256xf32> to vector<2x32xf32>
    %344 = arith.mulf %343, %254 : vector<2x32xf32>
    %cst_60 = arith.constant dense<0.000000e+00> : vector<2xf32>
    %345 = vector.multi_reduction <add>, %344, %cst_60 [1] : vector<2x32xf32> to vector<2xf32>
    %346 = vector.shape_cast %345 : vector<2xf32> to vector<2x1xf32>
    %c7_i32 = arith.constant 7 : i32
    %347 = vector.broadcast %c7_i32 : i32 to vector<1x8xi32>
    %348 = arith.cmpi eq, %257, %347 : vector<1x8xi32>
    %349 = arith.extui %348 : vector<1x8xi1> to vector<1x8xi32>
    %350 = arith.sitofp %349 : vector<1x8xi32> to vector<1x8xf32>
    %351 = vector.broadcast %346 : vector<2x1xf32> to vector<2x8xf32>
    %352 = vector.broadcast %350 : vector<1x8xf32> to vector<2x8xf32>
    %353 = arith.mulf %351, %352 : vector<2x8xf32>
    %354 = arith.addf %342, %353 : vector<2x8xf32>
    %c0_61 = arith.constant 0 : index
    %c0_62 = arith.constant 0 : index
    %355 = vector.load %arg11[%c0_61, %c0_62] : memref<1x8xf32, #tpu.memory_space<vmem>>, vector<1x8xf32>
    %356 = vector.broadcast %355 : vector<1x8xf32> to vector<2x8xf32>
    %357 = arith.addf %354, %356 : vector<2x8xf32>
    %c0_63 = arith.constant 0 : index
    %c0_64 = arith.constant 0 : index
    %358 = vector.load %arg20[%c0_63, %c0_64] : memref<2x8xf32, #tpu.memory_space<vmem>>, vector<2x8xf32>
    tpu.vector_store %arg20[%c0_63, %c0_64], %357 {strides = array<i32>} : memref<2x8xf32, #tpu.memory_space<vmem>>, vector<2x8xf32>,
    %359 = vector.extract_strided_slice %253 {offsets = [0, 0], sizes = [1, 32], strides = [1, 1]} : vector<2x32xf32> to vector<1x32xf32>
    %c0_65 = arith.constant 0 : index
    %c0_66 = arith.constant 0 : index
    %c0_67 = arith.constant 0 : index
    %360 = vector.load %arg3[%c0_65, %c0_66, %c0_67] : memref<2x32x128xf32, #tpu.memory_space<vmem>>, vector<1x32x128xf32>
    %361 = vector.shape_cast %360 : vector<1x32x128xf32> to vector<32x128xf32>
    %cst_68 = arith.constant dense<0.000000e+00> : vector<1x128xf32>
    %362 = tpu.matmul %359, %361, %cst_68 {dimension_numbers = #tpu.dot_dimension_numbers<[1], [0], [0], [1], [0, 0, 1, 1], [], []>} : vector<1x32xf32>, vector<32x128xf32>, vector<1x128xf32> -> vector<1x128xf32>
    %c0_69 = arith.constant 0 : index
    %c0_70 = arith.constant 0 : index
    %363 = vector.load %arg21[%c0_69, %c0_70] : memref<2x128xf32, #tpu.memory_space<vmem>>, vector<1x128xf32>
    tpu.vector_store %arg21[%c0_69, %c0_70], %362 {strides = array<i32>} : memref<2x128xf32, #tpu.memory_space<vmem>>, vector<1x128xf32>,
    %364 = vector.extract_strided_slice %253 {offsets = [1, 0], sizes = [1, 32], strides = [1, 1]} : vector<2x32xf32> to vector<1x32xf32>
    %c1 = arith.constant 1 : index
    %c0_71 = arith.constant 0 : index
    %c0_72 = arith.constant 0 : index
    %365 = vector.load %arg3[%c1, %c0_71, %c0_72] : memref<2x32x128xf32, #tpu.memory_space<vmem>>, vector<1x32x128xf32>
    %366 = vector.shape_cast %365 : vector<1x32x128xf32> to vector<32x128xf32>
    %cst_73 = arith.constant dense<0.000000e+00> : vector<1x128xf32>
    %367 = tpu.matmul %364, %366, %cst_73 {dimension_numbers = #tpu.dot_dimension_numbers<[1], [0], [0], [1], [0, 0, 1, 1], [], []>} : vector<1x32xf32>, vector<32x128xf32>, vector<1x128xf32> -> vector<1x128xf32>
    %c1_74 = arith.constant 1 : index
    %c0_75 = arith.constant 0 : index
    %368 = vector.load %arg21[%c1_74, %c0_75] : memref<2x128xf32, #tpu.memory_space<vmem>>, vector<1x128xf32>
    tpu.vector_store %arg21[%c1_74, %c0_75], %367 {strides = array<i32>} : memref<2x128xf32, #tpu.memory_space<vmem>>, vector<1x128xf32>,
    %369 = arith.addf %254, %253 : vector<2x32xf32>
    %c0_76 = arith.constant 0 : index
    %c0_77 = arith.constant 0 : index
    %370 = vector.load %arg1[%c0_76, %c0_77] : memref<12x16xf32, #tpu.memory_space<vmem>>, vector<12x16xf32>
    %c0_78 = arith.constant 0 : index
    %c0_79 = arith.constant 0 : index
    %371 = vector.load %arg12[%c0_78, %c0_79] : memref<16x32xf32, #tpu.memory_space<vmem>>, vector<16x32xf32>
    %cst_80 = arith.constant dense<0.000000e+00> : vector<12x32xf32>
    %372 = tpu.matmul %370, %371, %cst_80 {dimension_numbers = #tpu.dot_dimension_numbers<[1], [0], [0], [1], [0, 0, 1, 1], [], []>} : vector<12x16xf32>, vector<16x32xf32>, vector<12x32xf32> -> vector<12x32xf32>
    %c0_81 = arith.constant 0 : index
    %c0_82 = arith.constant 0 : index
    %373 = vector.load %arg13[%c0_81, %c0_82] : memref<1x32xf32, #tpu.memory_space<vmem>>, vector<1x32xf32>
    %374 = vector.broadcast %373 : vector<1x32xf32> to vector<12x32xf32>
    %375 = arith.addf %372, %374 : vector<12x32xf32>
    %c0_83 = arith.constant 0 : index
    %c0_84 = arith.constant 0 : index
    %376 = vector.load %arg14[%c0_83, %c0_84] : memref<32x96xf32, #tpu.memory_space<vmem>>, vector<32x96xf32>
    %cst_85 = arith.constant dense<0.000000e+00> : vector<12x96xf32>
    %377 = tpu.matmul %375, %376, %cst_85 {dimension_numbers = #tpu.dot_dimension_numbers<[1], [0], [0], [1], [0, 0, 1, 1], [], []>} : vector<12x32xf32>, vector<32x96xf32>, vector<12x96xf32> -> vector<12x96xf32>
    %c0_86 = arith.constant 0 : index
    %c0_87 = arith.constant 0 : index
    %378 = vector.load %arg16[%c0_86, %c0_87] : memref<1x96xf32, #tpu.memory_space<vmem>>, vector<1x96xf32>
    %379 = vector.broadcast %378 : vector<1x96xf32> to vector<12x96xf32>
    %380 = arith.addf %377, %379 : vector<12x96xf32>
    %c0_88 = arith.constant 0 : index
    %c0_89 = arith.constant 0 : index
    %381 = vector.load %arg15[%c0_88, %c0_89] : memref<32x96xf32, #tpu.memory_space<vmem>>, vector<32x96xf32>
    %c0_90 = arith.constant 0 : index
    %c0_91 = arith.constant 0 : index
    %382 = vector.load %arg17[%c0_90, %c0_91] : memref<1x96xf32, #tpu.memory_space<vmem>>, vector<1x96xf32>
    %c0_92 = arith.constant 0 : index
    %c0_93 = arith.constant 0 : index
    %383 = vector.load %arg18[%c0_92, %c0_93] : memref<32x16xf32, #tpu.memory_space<vmem>>, vector<32x16xf32>
    %c0_94 = arith.constant 0 : index
    %c0_95 = arith.constant 0 : index
    %384 = vector.load %arg19[%c0_94, %c0_95] : memref<1x16xf32, #tpu.memory_space<vmem>>, vector<1x16xf32>
    %385 = vector.extract_strided_slice %380 {offsets = [0, 0], sizes = [2, 96], strides = [1, 1]} : vector<12x96xf32> to vector<2x96xf32>
    %cst_96 = arith.constant dense<0.000000e+00> : vector<2x96xf32>
    %386 = tpu.matmul %369, %381, %cst_96 {dimension_numbers = #tpu.dot_dimension_numbers<[1], [0], [0], [1], [0, 0, 1, 1], [], []>} : vector<2x32xf32>, vector<32x96xf32>, vector<2x96xf32> -> vector<2x96xf32>
    %387 = vector.broadcast %382 : vector<1x96xf32> to vector<2x96xf32>
    %388 = arith.addf %386, %387 : vector<2x96xf32>
    %389 = vector.extract_strided_slice %385 {offsets = [0, 0], sizes = [2, 32], strides = [1, 1]} : vector<2x96xf32> to vector<2x32xf32>
    %390 = vector.extract_strided_slice %388 {offsets = [0, 0], sizes = [2, 32], strides = [1, 1]} : vector<2x96xf32> to vector<2x32xf32>
    %391 = arith.addf %389, %390 : vector<2x32xf32>
    %392 = arith.negf %391 : vector<2x32xf32>
    %393 = math.exp %392 : vector<2x32xf32>
    %cst_97 = arith.constant 1.000000e+00 : f32
    %394 = vector.broadcast %cst_97 : f32 to vector<2x32xf32>
    %395 = arith.addf %394, %393 : vector<2x32xf32>
    %396 = arith.divf %394, %395 : vector<2x32xf32>
    %397 = vector.extract_strided_slice %385 {offsets = [0, 32], sizes = [2, 32], strides = [1, 1]} : vector<2x96xf32> to vector<2x32xf32>
    %398 = vector.extract_strided_slice %388 {offsets = [0, 32], sizes = [2, 32], strides = [1, 1]} : vector<2x96xf32> to vector<2x32xf32>
    %399 = arith.addf %397, %398 : vector<2x32xf32>
    %400 = arith.negf %399 : vector<2x32xf32>
    %401 = math.exp %400 : vector<2x32xf32>
    %cst_98 = arith.constant 1.000000e+00 : f32
    %402 = vector.broadcast %cst_98 : f32 to vector<2x32xf32>
    %403 = arith.addf %402, %401 : vector<2x32xf32>
    %404 = arith.divf %402, %403 : vector<2x32xf32>
    %405 = vector.extract_strided_slice %385 {offsets = [0, 64], sizes = [2, 32], strides = [1, 1]} : vector<2x96xf32> to vector<2x32xf32>
    %406 = vector.extract_strided_slice %388 {offsets = [0, 64], sizes = [2, 32], strides = [1, 1]} : vector<2x96xf32> to vector<2x32xf32>
    %407 = arith.mulf %396, %406 : vector<2x32xf32>
    %408 = arith.addf %405, %407 : vector<2x32xf32>
    %409 = math.tanh %408 : vector<2x32xf32>
    %cst_99 = arith.constant 1.000000e+00 : f32
    %410 = vector.broadcast %cst_99 : f32 to vector<2x32xf32>
    %411 = arith.subf %410, %404 : vector<2x32xf32>
    %412 = arith.mulf %411, %409 : vector<2x32xf32>
    %413 = arith.mulf %404, %369 : vector<2x32xf32>
    %414 = arith.addf %412, %413 : vector<2x32xf32>
    %cst_100 = arith.constant dense<0.000000e+00> : vector<2x16xf32>
    %415 = tpu.matmul %414, %383, %cst_100 {dimension_numbers = #tpu.dot_dimension_numbers<[1], [0], [0], [1], [0, 0, 1, 1], [], []>} : vector<2x32xf32>, vector<32x16xf32>, vector<2x16xf32> -> vector<2x16xf32>
    %416 = vector.broadcast %384 : vector<1x16xf32> to vector<2x16xf32>
    %417 = arith.addf %415, %416 : vector<2x16xf32>
    %c0_101 = arith.constant 0 : index
    %c0_102 = arith.constant 0 : index
    %418 = vector.load %arg22[%c0_101, %c0_102] : memref<12x16xf32, #tpu.memory_space<vmem>>, vector<2x16xf32>
    tpu.vector_store %arg22[%c0_101, %c0_102], %417 {strides = array<i32>} : memref<12x16xf32, #tpu.memory_space<vmem>>, vector<2x16xf32>,
    %419 = vector.extract_strided_slice %380 {offsets = [2, 0], sizes = [2, 96], strides = [1, 1]} : vector<12x96xf32> to vector<2x96xf32>
    %cst_103 = arith.constant dense<0.000000e+00> : vector<2x96xf32>
    %420 = tpu.matmul %414, %381, %cst_103 {dimension_numbers = #tpu.dot_dimension_numbers<[1], [0], [0], [1], [0, 0, 1, 1], [], []>} : vector<2x32xf32>, vector<32x96xf32>, vector<2x96xf32> -> vector<2x96xf32>
    %421 = vector.broadcast %382 : vector<1x96xf32> to vector<2x96xf32>
    %422 = arith.addf %420, %421 : vector<2x96xf32>
    %423 = vector.extract_strided_slice %419 {offsets = [0, 0], sizes = [2, 32], strides = [1, 1]} : vector<2x96xf32> to vector<2x32xf32>
    %424 = vector.extract_strided_slice %422 {offsets = [0, 0], sizes = [2, 32], strides = [1, 1]} : vector<2x96xf32> to vector<2x32xf32>
    %425 = arith.addf %423, %424 : vector<2x32xf32>
    %426 = arith.negf %425 : vector<2x32xf32>
    %427 = math.exp %426 : vector<2x32xf32>
    %cst_104 = arith.constant 1.000000e+00 : f32
    %428 = vector.broadcast %cst_104 : f32 to vector<2x32xf32>
    %429 = arith.addf %428, %427 : vector<2x32xf32>
    %430 = arith.divf %428, %429 : vector<2x32xf32>
    %431 = vector.extract_strided_slice %419 {offsets = [0, 32], sizes = [2, 32], strides = [1, 1]} : vector<2x96xf32> to vector<2x32xf32>
    %432 = vector.extract_strided_slice %422 {offsets = [0, 32], sizes = [2, 32], strides = [1, 1]} : vector<2x96xf32> to vector<2x32xf32>
    %433 = arith.addf %431, %432 : vector<2x32xf32>
    %434 = arith.negf %433 : vector<2x32xf32>
    %435 = math.exp %434 : vector<2x32xf32>
    %cst_105 = arith.constant 1.000000e+00 : f32
    %436 = vector.broadcast %cst_105 : f32 to vector<2x32xf32>
    %437 = arith.addf %436, %435 : vector<2x32xf32>
    %438 = arith.divf %436, %437 : vector<2x32xf32>
    %439 = vector.extract_strided_slice %419 {offsets = [0, 64], sizes = [2, 32], strides = [1, 1]} : vector<2x96xf32> to vector<2x32xf32>
    %440 = vector.extract_strided_slice %422 {offsets = [0, 64], sizes = [2, 32], strides = [1, 1]} : vector<2x96xf32> to vector<2x32xf32>
    %441 = arith.mulf %430, %440 : vector<2x32xf32>
    %442 = arith.addf %439, %441 : vector<2x32xf32>
    %443 = math.tanh %442 : vector<2x32xf32>
    %cst_106 = arith.constant 1.000000e+00 : f32
    %444 = vector.broadcast %cst_106 : f32 to vector<2x32xf32>
    %445 = arith.subf %444, %438 : vector<2x32xf32>
    %446 = arith.mulf %445, %443 : vector<2x32xf32>
    %447 = arith.mulf %438, %414 : vector<2x32xf32>
    %448 = arith.addf %446, %447 : vector<2x32xf32>
    %cst_107 = arith.constant dense<0.000000e+00> : vector<2x16xf32>
    %449 = tpu.matmul %448, %383, %cst_107 {dimension_numbers = #tpu.dot_dimension_numbers<[1], [0], [0], [1], [0, 0, 1, 1], [], []>} : vector<2x32xf32>, vector<32x16xf32>, vector<2x16xf32> -> vector<2x16xf32>
    %450 = vector.broadcast %384 : vector<1x16xf32> to vector<2x16xf32>
    %451 = arith.addf %449, %450 : vector<2x16xf32>
    %c2 = arith.constant 2 : index
    %c0_108 = arith.constant 0 : index
    %452 = vector.load %arg22[%c2, %c0_108] : memref<12x16xf32, #tpu.memory_space<vmem>>, vector<2x16xf32>
    tpu.vector_store %arg22[%c2, %c0_108], %451 {strides = array<i32>} : memref<12x16xf32, #tpu.memory_space<vmem>>, vector<2x16xf32>,
    %453 = vector.extract_strided_slice %380 {offsets = [4, 0], sizes = [2, 96], strides = [1, 1]} : vector<12x96xf32> to vector<2x96xf32>
    %cst_109 = arith.constant dense<0.000000e+00> : vector<2x96xf32>
    %454 = tpu.matmul %448, %381, %cst_109 {dimension_numbers = #tpu.dot_dimension_numbers<[1], [0], [0], [1], [0, 0, 1, 1], [], []>} : vector<2x32xf32>, vector<32x96xf32>, vector<2x96xf32> -> vector<2x96xf32>
    %455 = vector.broadcast %382 : vector<1x96xf32> to vector<2x96xf32>
    %456 = arith.addf %454, %455 : vector<2x96xf32>
    %457 = vector.extract_strided_slice %453 {offsets = [0, 0], sizes = [2, 32], strides = [1, 1]} : vector<2x96xf32> to vector<2x32xf32>
    %458 = vector.extract_strided_slice %456 {offsets = [0, 0], sizes = [2, 32], strides = [1, 1]} : vector<2x96xf32> to vector<2x32xf32>
    %459 = arith.addf %457, %458 : vector<2x32xf32>
    %460 = arith.negf %459 : vector<2x32xf32>
    %461 = math.exp %460 : vector<2x32xf32>
    %cst_110 = arith.constant 1.000000e+00 : f32
    %462 = vector.broadcast %cst_110 : f32 to vector<2x32xf32>
    %463 = arith.addf %462, %461 : vector<2x32xf32>
    %464 = arith.divf %462, %463 : vector<2x32xf32>
    %465 = vector.extract_strided_slice %453 {offsets = [0, 32], sizes = [2, 32], strides = [1, 1]} : vector<2x96xf32> to vector<2x32xf32>
    %466 = vector.extract_strided_slice %456 {offsets = [0, 32], sizes = [2, 32], strides = [1, 1]} : vector<2x96xf32> to vector<2x32xf32>
    %467 = arith.addf %465, %466 : vector<2x32xf32>
    %468 = arith.negf %467 : vector<2x32xf32>
    %469 = math.exp %468 : vector<2x32xf32>
    %cst_111 = arith.constant 1.000000e+00 : f32
    %470 = vector.broadcast %cst_111 : f32 to vector<2x32xf32>
    %471 = arith.addf %470, %469 : vector<2x32xf32>
    %472 = arith.divf %470, %471 : vector<2x32xf32>
    %473 = vector.extract_strided_slice %453 {offsets = [0, 64], sizes = [2, 32], strides = [1, 1]} : vector<2x96xf32> to vector<2x32xf32>
    %474 = vector.extract_strided_slice %456 {offsets = [0, 64], sizes = [2, 32], strides = [1, 1]} : vector<2x96xf32> to vector<2x32xf32>
    %475 = arith.mulf %464, %474 : vector<2x32xf32>
    %476 = arith.addf %473, %475 : vector<2x32xf32>
    %477 = math.tanh %476 : vector<2x32xf32>
    %cst_112 = arith.constant 1.000000e+00 : f32
    %478 = vector.broadcast %cst_112 : f32 to vector<2x32xf32>
    %479 = arith.subf %478, %472 : vector<2x32xf32>
    %480 = arith.mulf %479, %477 : vector<2x32xf32>
    %481 = arith.mulf %472, %448 : vector<2x32xf32>
    %482 = arith.addf %480, %481 : vector<2x32xf32>
    %cst_113 = arith.constant dense<0.000000e+00> : vector<2x16xf32>
    %483 = tpu.matmul %482, %383, %cst_113 {dimension_numbers = #tpu.dot_dimension_numbers<[1], [0], [0], [1], [0, 0, 1, 1], [], []>} : vector<2x32xf32>, vector<32x16xf32>, vector<2x16xf32> -> vector<2x16xf32>
    %484 = vector.broadcast %384 : vector<1x16xf32> to vector<2x16xf32>
    %485 = arith.addf %483, %484 : vector<2x16xf32>
    %c4 = arith.constant 4 : index
    %c0_114 = arith.constant 0 : index
    %486 = vector.load %arg22[%c4, %c0_114] : memref<12x16xf32, #tpu.memory_space<vmem>>, vector<2x16xf32>
    tpu.vector_store %arg22[%c4, %c0_114], %485 {strides = array<i32>} : memref<12x16xf32, #tpu.memory_space<vmem>>, vector<2x16xf32>,
    %487 = vector.extract_strided_slice %380 {offsets = [6, 0], sizes = [2, 96], strides = [1, 1]} : vector<12x96xf32> to vector<2x96xf32>
    %cst_115 = arith.constant dense<0.000000e+00> : vector<2x96xf32>
    %488 = tpu.matmul %482, %381, %cst_115 {dimension_numbers = #tpu.dot_dimension_numbers<[1], [0], [0], [1], [0, 0, 1, 1], [], []>} : vector<2x32xf32>, vector<32x96xf32>, vector<2x96xf32> -> vector<2x96xf32>
    %489 = vector.broadcast %382 : vector<1x96xf32> to vector<2x96xf32>
    %490 = arith.addf %488, %489 : vector<2x96xf32>
    %491 = vector.extract_strided_slice %487 {offsets = [0, 0], sizes = [2, 32], strides = [1, 1]} : vector<2x96xf32> to vector<2x32xf32>
    %492 = vector.extract_strided_slice %490 {offsets = [0, 0], sizes = [2, 32], strides = [1, 1]} : vector<2x96xf32> to vector<2x32xf32>
    %493 = arith.addf %491, %492 : vector<2x32xf32>
    %494 = arith.negf %493 : vector<2x32xf32>
    %495 = math.exp %494 : vector<2x32xf32>
    %cst_116 = arith.constant 1.000000e+00 : f32
    %496 = vector.broadcast %cst_116 : f32 to vector<2x32xf32>
    %497 = arith.addf %496, %495 : vector<2x32xf32>
    %498 = arith.divf %496, %497 : vector<2x32xf32>
    %499 = vector.extract_strided_slice %487 {offsets = [0, 32], sizes = [2, 32], strides = [1, 1]} : vector<2x96xf32> to vector<2x32xf32>
    %500 = vector.extract_strided_slice %490 {offsets = [0, 32], sizes = [2, 32], strides = [1, 1]} : vector<2x96xf32> to vector<2x32xf32>
    %501 = arith.addf %499, %500 : vector<2x32xf32>
    %502 = arith.negf %501 : vector<2x32xf32>
    %503 = math.exp %502 : vector<2x32xf32>
    %cst_117 = arith.constant 1.000000e+00 : f32
    %504 = vector.broadcast %cst_117 : f32 to vector<2x32xf32>
    %505 = arith.addf %504, %503 : vector<2x32xf32>
    %506 = arith.divf %504, %505 : vector<2x32xf32>
    %507 = vector.extract_strided_slice %487 {offsets = [0, 64], sizes = [2, 32], strides = [1, 1]} : vector<2x96xf32> to vector<2x32xf32>
    %508 = vector.extract_strided_slice %490 {offsets = [0, 64], sizes = [2, 32], strides = [1, 1]} : vector<2x96xf32> to vector<2x32xf32>
    %509 = arith.mulf %498, %508 : vector<2x32xf32>
    %510 = arith.addf %507, %509 : vector<2x32xf32>
    %511 = math.tanh %510 : vector<2x32xf32>
    %cst_118 = arith.constant 1.000000e+00 : f32
    %512 = vector.broadcast %cst_118 : f32 to vector<2x32xf32>
    %513 = arith.subf %512, %506 : vector<2x32xf32>
    %514 = arith.mulf %513, %511 : vector<2x32xf32>
    %515 = arith.mulf %506, %482 : vector<2x32xf32>
    %516 = arith.addf %514, %515 : vector<2x32xf32>
    %cst_119 = arith.constant dense<0.000000e+00> : vector<2x16xf32>
    %517 = tpu.matmul %516, %383, %cst_119 {dimension_numbers = #tpu.dot_dimension_numbers<[1], [0], [0], [1], [0, 0, 1, 1], [], []>} : vector<2x32xf32>, vector<32x16xf32>, vector<2x16xf32> -> vector<2x16xf32>
    %518 = vector.broadcast %384 : vector<1x16xf32> to vector<2x16xf32>
    %519 = arith.addf %517, %518 : vector<2x16xf32>
    %c6 = arith.constant 6 : index
    %c0_120 = arith.constant 0 : index
    %520 = vector.load %arg22[%c6, %c0_120] : memref<12x16xf32, #tpu.memory_space<vmem>>, vector<2x16xf32>
    tpu.vector_store %arg22[%c6, %c0_120], %519 {strides = array<i32>} : memref<12x16xf32, #tpu.memory_space<vmem>>, vector<2x16xf32>,
    %521 = vector.extract_strided_slice %380 {offsets = [8, 0], sizes = [2, 96], strides = [1, 1]} : vector<12x96xf32> to vector<2x96xf32>
    %cst_121 = arith.constant dense<0.000000e+00> : vector<2x96xf32>
    %522 = tpu.matmul %516, %381, %cst_121 {dimension_numbers = #tpu.dot_dimension_numbers<[1], [0], [0], [1], [0, 0, 1, 1], [], []>} : vector<2x32xf32>, vector<32x96xf32>, vector<2x96xf32> -> vector<2x96xf32>
    %523 = vector.broadcast %382 : vector<1x96xf32> to vector<2x96xf32>
    %524 = arith.addf %522, %523 : vector<2x96xf32>
    %525 = vector.extract_strided_slice %521 {offsets = [0, 0], sizes = [2, 32], strides = [1, 1]} : vector<2x96xf32> to vector<2x32xf32>
    %526 = vector.extract_strided_slice %524 {offsets = [0, 0], sizes = [2, 32], strides = [1, 1]} : vector<2x96xf32> to vector<2x32xf32>
    %527 = arith.addf %525, %526 : vector<2x32xf32>
    %528 = arith.negf %527 : vector<2x32xf32>
    %529 = math.exp %528 : vector<2x32xf32>
    %cst_122 = arith.constant 1.000000e+00 : f32
    %530 = vector.broadcast %cst_122 : f32 to vector<2x32xf32>
    %531 = arith.addf %530, %529 : vector<2x32xf32>
    %532 = arith.divf %530, %531 : vector<2x32xf32>
    %533 = vector.extract_strided_slice %521 {offsets = [0, 32], sizes = [2, 32], strides = [1, 1]} : vector<2x96xf32> to vector<2x32xf32>
    %534 = vector.extract_strided_slice %524 {offsets = [0, 32], sizes = [2, 32], strides = [1, 1]} : vector<2x96xf32> to vector<2x32xf32>
    %535 = arith.addf %533, %534 : vector<2x32xf32>
    %536 = arith.negf %535 : vector<2x32xf32>
    %537 = math.exp %536 : vector<2x32xf32>
    %cst_123 = arith.constant 1.000000e+00 : f32
    %538 = vector.broadcast %cst_123 : f32 to vector<2x32xf32>
    %539 = arith.addf %538, %537 : vector<2x32xf32>
    %540 = arith.divf %538, %539 : vector<2x32xf32>
    %541 = vector.extract_strided_slice %521 {offsets = [0, 64], sizes = [2, 32], strides = [1, 1]} : vector<2x96xf32> to vector<2x32xf32>
    %542 = vector.extract_strided_slice %524 {offsets = [0, 64], sizes = [2, 32], strides = [1, 1]} : vector<2x96xf32> to vector<2x32xf32>
    %543 = arith.mulf %532, %542 : vector<2x32xf32>
    %544 = arith.addf %541, %543 : vector<2x32xf32>
    %545 = math.tanh %544 : vector<2x32xf32>
    %cst_124 = arith.constant 1.000000e+00 : f32
    %546 = vector.broadcast %cst_124 : f32 to vector<2x32xf32>
    %547 = arith.subf %546, %540 : vector<2x32xf32>
    %548 = arith.mulf %547, %545 : vector<2x32xf32>
    %549 = arith.mulf %540, %516 : vector<2x32xf32>
    %550 = arith.addf %548, %549 : vector<2x32xf32>
    %cst_125 = arith.constant dense<0.000000e+00> : vector<2x16xf32>
    %551 = tpu.matmul %550, %383, %cst_125 {dimension_numbers = #tpu.dot_dimension_numbers<[1], [0], [0], [1], [0, 0, 1, 1], [], []>} : vector<2x32xf32>, vector<32x16xf32>, vector<2x16xf32> -> vector<2x16xf32>
    %552 = vector.broadcast %384 : vector<1x16xf32> to vector<2x16xf32>
    %553 = arith.addf %551, %552 : vector<2x16xf32>
    %c8 = arith.constant 8 : index
    %c0_126 = arith.constant 0 : index
    %554 = vector.load %arg22[%c8, %c0_126] : memref<12x16xf32, #tpu.memory_space<vmem>>, vector<2x16xf32>
    tpu.vector_store %arg22[%c8, %c0_126], %553 {strides = array<i32>} : memref<12x16xf32, #tpu.memory_space<vmem>>, vector<2x16xf32>,
    %555 = vector.extract_strided_slice %380 {offsets = [10, 0], sizes = [2, 96], strides = [1, 1]} : vector<12x96xf32> to vector<2x96xf32>
    %cst_127 = arith.constant dense<0.000000e+00> : vector<2x96xf32>
    %556 = tpu.matmul %550, %381, %cst_127 {dimension_numbers = #tpu.dot_dimension_numbers<[1], [0], [0], [1], [0, 0, 1, 1], [], []>} : vector<2x32xf32>, vector<32x96xf32>, vector<2x96xf32> -> vector<2x96xf32>
    %557 = vector.broadcast %382 : vector<1x96xf32> to vector<2x96xf32>
    %558 = arith.addf %556, %557 : vector<2x96xf32>
    %559 = vector.extract_strided_slice %555 {offsets = [0, 0], sizes = [2, 32], strides = [1, 1]} : vector<2x96xf32> to vector<2x32xf32>
    %560 = vector.extract_strided_slice %558 {offsets = [0, 0], sizes = [2, 32], strides = [1, 1]} : vector<2x96xf32> to vector<2x32xf32>
    %561 = arith.addf %559, %560 : vector<2x32xf32>
    %562 = arith.negf %561 : vector<2x32xf32>
    %563 = math.exp %562 : vector<2x32xf32>
    %cst_128 = arith.constant 1.000000e+00 : f32
    %564 = vector.broadcast %cst_128 : f32 to vector<2x32xf32>
    %565 = arith.addf %564, %563 : vector<2x32xf32>
    %566 = arith.divf %564, %565 : vector<2x32xf32>
    %567 = vector.extract_strided_slice %555 {offsets = [0, 32], sizes = [2, 32], strides = [1, 1]} : vector<2x96xf32> to vector<2x32xf32>
    %568 = vector.extract_strided_slice %558 {offsets = [0, 32], sizes = [2, 32], strides = [1, 1]} : vector<2x96xf32> to vector<2x32xf32>
    %569 = arith.addf %567, %568 : vector<2x32xf32>
    %570 = arith.negf %569 : vector<2x32xf32>
    %571 = math.exp %570 : vector<2x32xf32>
    %cst_129 = arith.constant 1.000000e+00 : f32
    %572 = vector.broadcast %cst_129 : f32 to vector<2x32xf32>
    %573 = arith.addf %572, %571 : vector<2x32xf32>
    %574 = arith.divf %572, %573 : vector<2x32xf32>
    %575 = vector.extract_strided_slice %555 {offsets = [0, 64], sizes = [2, 32], strides = [1, 1]} : vector<2x96xf32> to vector<2x32xf32>
    %576 = vector.extract_strided_slice %558 {offsets = [0, 64], sizes = [2, 32], strides = [1, 1]} : vector<2x96xf32> to vector<2x32xf32>
    %577 = arith.mulf %566, %576 : vector<2x32xf32>
    %578 = arith.addf %575, %577 : vector<2x32xf32>
    %579 = math.tanh %578 : vector<2x32xf32>
    %cst_130 = arith.constant 1.000000e+00 : f32
    %580 = vector.broadcast %cst_130 : f32 to vector<2x32xf32>
    %581 = arith.subf %580, %574 : vector<2x32xf32>
    %582 = arith.mulf %581, %579 : vector<2x32xf32>
    %583 = arith.mulf %574, %550 : vector<2x32xf32>
    %584 = arith.addf %582, %583 : vector<2x32xf32>
    %cst_131 = arith.constant dense<0.000000e+00> : vector<2x16xf32>
    %585 = tpu.matmul %584, %383, %cst_131 {dimension_numbers = #tpu.dot_dimension_numbers<[1], [0], [0], [1], [0, 0, 1, 1], [], []>} : vector<2x32xf32>, vector<32x16xf32>, vector<2x16xf32> -> vector<2x16xf32>
    %586 = vector.broadcast %384 : vector<1x16xf32> to vector<2x16xf32>
    %587 = arith.addf %585, %586 : vector<2x16xf32>
    %c10 = arith.constant 10 : index
    %c0_132 = arith.constant 0 : index
    %588 = vector.load %arg22[%c10, %c0_132] : memref<12x16xf32, #tpu.memory_space<vmem>>, vector<2x16xf32>
    tpu.vector_store %arg22[%c10, %c0_132], %587 {strides = array<i32>} : memref<12x16xf32, #tpu.memory_space<vmem>>, vector<2x16xf32>,
    return
  }
}

</mosaic_0001>

<bundles_post_ra>
// kernel: policy_forward_pallas.1
= control target key start
LH: loop header
LB: loop body
LE: loop exit
PB: predicated region body
PF: predicated region fallthrough
CT: control target
= control target key end

     0   :  { %s4199_s0 = inlined_call_operand.vmem [shape: f32[16,16], index: 0, kind: input, shape index: {}]   ;;  %s4200_s1 = inlined_call_operand.vmem [shape: f32[12,16], index: 1, kind: input, shape index: {}]   ;;  %s4201_s2 = inlined_call_operand.vmem [shape: f32[2,32], index: 2, kind: input, shape index: {}]   ;;  %s4202_s3 = inlined_call_operand.vmem [shape: f32[2,32,128], index: 3, kind: input, shape index: {}]   ;;  %s4203_s4 = inlined_call_operand.vmem [shape: f32[16,16], index: 4, kind: input, shape index: {}]   ;;  %s4204_s5 = inlined_call_operand.vmem [shape: f32[1,16], index: 5, kind: input, shape index: {}]   ;;  %s4205_s6 = inlined_call_operand.vmem [shape: f32[16,96], index: 6, kind: input, shape index: {}]   ;;  %s4206_s7 = inlined_call_operand.vmem [shape: f32[32,96], index: 7, kind: input, shape index: {}]   ;;  %s4207_s8 = inlined_call_operand.vmem [shape: f32[1,96], index: 8, kind: input, shape index: {}]   ;;  %s4208_s9 = inlined_call_operand.vmem [shape: f32[1,96], index: 9, kind: input, shape index: {}]   ;;  %s4209_s10 = inlined_call_operand.vmem [shape: f32[32,256], index: 10, kind: input, shape index: {}]   ;;  %s4210_s11 = inlined_call_operand.vmem [shape: f32[1,8], index: 11, kind: input, shape index: {}]   ;;  %s4211_s12 = inlined_call_operand.vmem [shape: f32[16,32], index: 12, kind: input, shape index: {}]   ;;  %s4212_s13 = inlined_call_operand.vmem [shape: f32[1,32], index: 13, kind: input, shape index: {}]   ;;  %s4213_s14 = inlined_call_operand.vmem [shape: f32[32,96], index: 14, kind: input, shape index: {}]   ;;  %s4214_s15 = inlined_call_operand.vmem [shape: f32[32,96], index: 15, kind: input, shape index: {}]   ;;  %s4215_s16 = inlined_call_operand.vmem [shape: f32[1,96], index: 16, kind: input, shape index: {}]   ;;  %s4216_s17 = inlined_call_operand.vmem [shape: f32[1,96], index: 17, kind: input, shape index: {}]   ;;  %s4217_s18 = inlined_call_operand.vmem [shape: f32[32,16], index: 18, kind: input, shape index: {}]   ;;  %s4218_s19 = inlined_call_operand.vmem [shape: f32[1,16], index: 19, kind: input, shape index: {}]   ;;  %s4219_s20 = inlined_call_operand.hbm [shape: f32[2,8], index: 20, kind: output, shape index: {0}]   ;;  %s4220_s21 = inlined_call_operand.hbm [shape: f32[2,128], index: 21, kind: output, shape index: {1}]   ;;  %s4221_s22 = inlined_call_operand.vmem [shape: f32[12,16], index: 22, kind: output, shape index: {2}]  }
   0x1   :  { %4227 = sst [smem:[#allocation8_spill]] %s4199_s0 }
   0x2   :  { %4228 = sst [smem:[#allocation9_spill]] %s4200_s1 }
   0x3   :  { %4229 = sst [smem:[#allocation10_spill]] %s4201_s2 }
   0x4   :  { %4230 = sst [smem:[#allocation11_spill]] %s4202_s3 }
   0x5   :  { %4231 = sst [smem:[#allocation12_spill]] %s4203_s4 }
   0x6   :  { %4232 = sst [smem:[#allocation13_spill]] %s4204_s5 }
   0x7   :  { %4233 = sst [smem:[#allocation14_spill]] %s4205_s6 }
   0x8   :  { %28 = vsyncpa [#allocation3], 0  ;;  %s4234_s29 = sld [smem:[#allocation12_spill]]  ;;  %s4235_s1 = sld [smem:[#allocation8_spill]]  ;;  %vm81_vm0 = vcmask 130048   ;;  %v253_v4 = vld [vmem:[%s4206_s7] sm:$0xff] }
   0x9   :  { %v254_v5 = vld [vmem:[%s4206_s7 + $0x8] sm:$0xff] }
   0xe   :  { %v72_v0 = vld [vmem:[%s4234_s29] sm:$0xff]  ;;  %v73_v1 = vld [vmem:[%s4234_s29 + $0x8] sm:$0xff] }
   0xf   :  { %v70_v2 = vld [vmem:[%s4235_s1] sm:$0xff]  ;;  %v3228_v3 = vpack.c.bf16 %v73_v1, %v72_v0 }
  0x10   :  { %2958 = vmatprep.mubr.msk.f32.mxu0 %vm81_vm0, %v70_v2 }
  0x11   :  { %29 = vsyncpa [#allocation5], 0  ;;  %3229 = vmatprep.subr.bf16.mxu0 %v3228_v3  ;;  %v71_v6 = vld [vmem:[%s4235_s1 + $0x8] sm:$0xff]  ;;  %v3670_v7 = vpack.c.bf16 %v254_v5, %v253_v4  ;;  %v3528_v8 = vmov 0.0|0.0   ;;  %v255_v9 = vld [vmem:[%s4206_s7 + $0x10] sm:$0xff]  ;;  %vm3529_vm1 = vmmov 0  }
  0x12   :  { %3231 = vmatpush3.bf16.msra.mxu0 %v3228_v3  ;;  %v256_v10 = vld [vmem:[%s4206_s7 + $0x18] sm:$0xff]  ;;  %v3530_v12 = vmov 0.0   ;;  %s4236_s4 = sld [smem:[#allocation14_spill]]  ;;  %s4237_s24 = sld [smem:[#allocation13_spill]]  ;;  %v3710_v21 = vld [vmem:[%s4208_s9] ss:$0 sm:$0xff] }
  0x13   :  { %3236 = vmatprep.subr.bf16.mxu0 %v3528_v8  ;;  %v3681_v11 = vpack.c.bf16 %v256_v10, %v255_v9  ;;  %s3531_s26 = smov 64   ;;  %v2765_v25 = vld [vmem:[%s4207_s8] ss:$0 sm:$0xff]  ;;  %s3532_s8 = smov 96   ;;  %vm264_vm2 = vcmask 261120   ;;  %vm1847_vm3 = vcmask 123904  }
  0x14   :  { %s4238_s5 = sld [smem:[#allocation11_spill]]  ;;  %s4240_s3 = sld [smem:[#allocation10_spill]]  ;;  %vm1190_vm4 = vcmask 254976  }
  0x15   :  { %2959 = vmatmul.mubr.msk.f32.vlgmr.msra.gmra.mrb[0].mxu0 %vm81_vm0, %v71_v6 }
  0x16   :  { %3238 = vmatpush3.bf16.msra.mxu0 %v3670_v7  ;;  %2976 = vmatprep.mubr.msk.f32.mxu0 %vm3529_vm1, %v3530_v12 }
  0x17   :  { %3239 = vmatprep.subr.bf16.mxu0 %v3528_v8 }
  0x18   :  { %v163_v13 = vld [vmem:[%s4236_s4] sm:$0xff]  ;;  %v164_v14 = vld [vmem:[%s4236_s4 + $0x8] sm:$0xff]  ;;  %s4239_s4 = sld [smem:[#allocation9_spill]] }
  0x19   :  { %v3232_v15 = vpack.c.bf16 %v164_v14, %v163_v13  ;;  %v2762_v16 = vld [vmem:[%s4237_s24] ss:$0 sm:$0xff] }
  0x1a   :  { %3241 = vmatpush3.bf16.msra.mxu0 %v3681_v11 }
  0x1b   :  { %3248 = vmatprep.subr.bf16.mxu0 %v3528_v8  ;;  %3233 = vmatprep.subr.bf16.mxu1 %v3232_v15 }
  0x1c   :  { %3235 = vmatpush3.bf16.msra.mxu1 %v3232_v15 }
  0x1d   :  { %2977 = vmatmul.mubr.f32.vlgmr.msra.gmra.mrb[2].mxu0 %v3530_v12  ;;  %3242 = vmatprep.subr.bf16.mxu1 %v3528_v8 }
  0x1e   :  { %3250 = vmatpush3.bf16.msra.mxu0 %v3670_v7  ;;  %2998 = vmatprep.mubr.msk.f32.mxu0 %vm3529_vm1, %v3530_v12 }
  0x1f   :  { %3251 = vmatprep.subr.bf16.mxu0 %v3528_v8 }
  0x22   :  { %3253 = vmatpush3.bf16.msra.mxu0 %v3681_v11 }
  0x23   :  { %3260 = vmatprep.subr.bf16.mxu0 %v3528_v8 }
  0xe8   :  { %v2960_v17 = vpop.f32.mrb[0].mxu0 }
  0xe9   :  { %v154_v18 = vpop.f32.mrb[1].mxu0  ;;  %v160_v20 = vadd.f32 %v2960_v17, %v2762_v16 }
  0xea   :  { %v155_v19 = vadd.f32 %v2762_v16, %v154_v18 }
  0xec   :  { %2965 = vmatprep.mubr.msk.f32.mxu1 %vm81_vm0, %v155_v19 }
  0xed   :  { %2966 = vmatmul.mubr.msk.f32.vlgmr.msra.gmra.mrb[0].mxu1 %vm81_vm0, %v160_v20 }
  0xee   :  { %3244 = vmatpush3.bf16.msra.mxu1 %v3670_v7  ;;  %2987 = vmatprep.mubr.msk.f32.mxu1 %vm3529_vm1, %v3530_v12 }
  0xef   :  { %3245 = vmatprep.subr.bf16.mxu1 %v3528_v8 }
  0xf0   :  { %v334_v22 = vpop.f32.mrb[2].mxu0 }
  0xf1   :  { %v335_v23 = vadd.f32 %v3710_v21, %v334_v22  ;;  %v2978_v24 = vpop.f32.mrb[3].mxu0 }
  0xf2   :  { %3247 = vmatpush3.bf16.msra.mxu1 %v3681_v11 }
  0xf3   :  { %346 = vrot.lane.b32.xlu0 %v335_v23, %s3531_s26  ;;  %3254 = vmatprep.subr.bf16.mxu1 %v3528_v8 }
 0x165   :  { %v347_v34 = vpop.permute.xlu0 %346 }
 0x1c0   :  { %v2967_v26 = vpop.f32.mrb[0].mxu1 }
 0x1c1   :  { %v3723_v27 = vadd.f32 %v2967_v26, %v2765_v25  ;;  %v244_v28 = vpop.f32.mrb[1].mxu1 }
 0x1c2   :  { %v3725_v29 = vadd.f32 %v2765_v25, %v244_v28 }
 0x1c4   :  { %v338_v30 = vadd.f32 %v335_v23, %v3725_v29 }
 0x1c6   :  { %v2769_v31 = vmul.f32 -1.442695, %v338_v30 }
 0x1c8   :  { %3396 = vpow2.f32 %v2769_v31 }
 0x1d2   :  { %v3397_v32 = vpop.eup %3396 }
 0x1d3   :  { %v342_v33 = vadd.f32 1.0, %v3397_v32 }
 0x1d5   :  { %3398 = vrcp.f32 %v342_v33 }
 0x1df   :  { %v3399_v35 = vpop.eup %3398 }
 0x1e0   :  { %v349_v36 = vmul.f32 %v3399_v35, %v347_v34  ;;  %v356_v40 = vsub.f32 1.0, %v3399_v35  ;;  %v362_v42 = vmul.f32 0.0, %v3399_v35 }
 0x1e2   :  { %351 = vrot.lane.b32.xlu0 %v349_v36, %s3531_s26 }
 0x254   :  { %v352_v37 = vpop.permute.xlu0 %351 }
 0x255   :  { %v354_v38 = vadd.f32 %v352_v37, %v3725_v29 }
 0x257   :  { %3400 = vtanh.f32 %v354_v38 }
 0x261   :  { %v3401_v39 = vpop.eup %3400 }
 0x262   :  { %358 = vrot.lane.b32.xlu1 %v3401_v39, %s3532_s8 }
 0x2d4   :  { %v359_v41 = vpop.permute.xlu1 %358 }
 0x2d5   :  { %v361_v43 = vmul.f32 %v359_v41, %v356_v40 }
 0x2d7   :  { %v363_v44 = vadd.f32 %v362_v42, %v361_v43 }
 0x2d9   :  { %365 = vrot.lane.b32.xlu1 %v363_v44, %s3532_s8  ;;  %v465_v60 = vrot.slane %v363_v44, 6 }
 0x34b   :  { %v366_v45 = vpop.permute.xlu1 %365 }
 0x34c   :  { %2988 = vmatmul.mubr.msk.f32.vlgmr.msra.gmra.mrb[2].mxu1 %vm264_vm2, %v366_v45 }
 0x34d   :  { %3256 = vmatpush3.bf16.msra.mxu1 %v3670_v7  ;;  %3009 = vmatprep.mubr.msk.f32.mxu1 %vm3529_vm1, %v3530_v12 }
 0x34e   :  { %3257 = vmatprep.subr.bf16.mxu1 %v3528_v8 }
 0x351   :  { %3259 = vmatpush3.bf16.msra.mxu1 %v3681_v11 }
 0x352   :  { %3266 = vmatprep.subr.bf16.mxu1 %v3528_v8 }
 0x41f   :  { %v435_v46 = vpop.f32.mrb[2].mxu1 }
 0x420   :  { %v436_v47 = vadd.f32 %v3710_v21, %v435_v46  ;;  %v2989_v48 = vpop.f32.mrb[3].mxu1 }
 0x422   :  { %v440_v49 = vrot.slane %v436_v47, 6 }
 0x424   :  { %449 = vrot.lane.b32.xlu0 %v440_v49, %s3531_s26  ;;  %v442_v50 = vadd.f32 %v440_v49, %v3725_v29 }
 0x426   :  { %v2771_v51 = vmul.f32 -1.442695, %v442_v50 }
 0x428   :  { %3402 = vpow2.f32 %v2771_v51 }
 0x432   :  { %v3403_v52 = vpop.eup %3402 }
 0x433   :  { %v446_v53 = vadd.f32 1.0, %v3403_v52 }
 0x435   :  { %3404 = vrcp.f32 %v446_v53 }
 0x43f   :  { %v3405_v54 = vpop.eup %3404 }
 0x440   :  { %v459_v61 = vsub.f32 1.0, %v3405_v54  ;;  %v467_v0 = vmul.f32 %v3405_v54, %v465_v60 }
 0x496   :  { %v450_v55 = vpop.permute.xlu0 %449 }
 0x497   :  { %v452_v56 = vmul.f32 %v3405_v54, %v450_v55 }
 0x499   :  { %454 = vrot.lane.b32.xlu1 %v452_v56, %s3531_s26 }
 0x50b   :  { %v455_v57 = vpop.permute.xlu1 %454 }
 0x50c   :  { %v457_v58 = vadd.f32 %v455_v57, %v3725_v29 }
 0x50e   :  { %3406 = vtanh.f32 %v457_v58 }
 0x518   :  { %v3407_v59 = vpop.eup %3406 }
 0x519   :  { %461 = vrot.lane.b32.xlu0 %v3407_v59, %s3532_s8 }
 0x58b   :  { %v462_v62 = vpop.permute.xlu0 %461 }
 0x58c   :  { %v464_v63 = vmul.f32 %v462_v62, %v459_v61 }
 0x58e   :  { %v468_v1 = vadd.f32 %v467_v0, %v464_v63 }
 0x590   :  { %v470_v2 = vrot.slane %v468_v1, 2  ;;  %v571_v23 = vrot.slane %v468_v1, 6 }
 0x592   :  { %471 = vrot.lane.b32.xlu1 %v470_v2, %s3532_s8 }
 0x604   :  { %v472_v3 = vpop.permute.xlu1 %471 }
 0x605   :  { %2999 = vmatmul.mubr.msk.f32.vlgmr.msra.gmra.mrb[4].mxu0 %vm264_vm2, %v472_v3 }
 0x606   :  { %3262 = vmatpush3.bf16.msra.mxu0 %v3670_v7  ;;  %3020 = vmatprep.mubr.msk.f32.mxu0 %vm3529_vm1, %v3530_v12 }
 0x607   :  { %3263 = vmatprep.subr.bf16.mxu0 %v3528_v8 }
 0x60a   :  { %3265 = vmatpush3.bf16.msra.mxu0 %v3681_v11 }
 0x60b   :  { %3272 = vmatprep.subr.bf16.mxu0 %v3528_v8 }
 0x6d8   :  { %v541_v4 = vpop.f32.mrb[4].mxu0 }
 0x6d9   :  { %v542_v5 = vadd.f32 %v3710_v21, %v541_v4  ;;  %v3000_v6 = vpop.f32.mrb[5].mxu0 }
 0x6db   :  { %v546_v9 = vrot.slane %v542_v5, 4 }
 0x6dd   :  { %555 = vrot.lane.b32.xlu0 %v546_v9, %s3531_s26  ;;  %v548_v10 = vadd.f32 %v546_v9, %v3725_v29 }
 0x6df   :  { %v2773_v13 = vmul.f32 -1.442695, %v548_v10 }
 0x6e1   :  { %3408 = vpow2.f32 %v2773_v13 }
 0x6eb   :  { %v3409_v14 = vpop.eup %3408 }
 0x6ec   :  { %v552_v15 = vadd.f32 1.0, %v3409_v14 }
 0x6ee   :  { %3410 = vrcp.f32 %v552_v15 }
 0x6f8   :  { %v3411_v16 = vpop.eup %3410 }
 0x6f9   :  { %v565_v24 = vsub.f32 1.0, %v3411_v16  ;;  %v573_v26 = vmul.f32 %v3411_v16, %v571_v23 }
 0x74f   :  { %v556_v17 = vpop.permute.xlu0 %555 }
 0x750   :  { %v558_v18 = vmul.f32 %v3411_v16, %v556_v17 }
 0x752   :  { %560 = vrot.lane.b32.xlu1 %v558_v18, %s3531_s26 }
 0x7c4   :  { %v561_v19 = vpop.permute.xlu1 %560 }
 0x7c5   :  { %v563_v20 = vadd.f32 %v561_v19, %v3725_v29 }
 0x7c7   :  { %3412 = vtanh.f32 %v563_v20 }
 0x7d1   :  { %v3413_v22 = vpop.eup %3412 }
 0x7d2   :  { %567 = vrot.lane.b32.xlu0 %v3413_v22, %s3532_s8 }
 0x844   :  { %v568_v25 = vpop.permute.xlu0 %567 }
 0x845   :  { %v570_v28 = vmul.f32 %v568_v25, %v565_v24 }
 0x847   :  { %v574_v30 = vadd.f32 %v573_v26, %v570_v28 }
 0x849   :  { %v576_v31 = vrot.slane %v574_v30, 4  ;;  %v677_v47 = vrot.slane %v574_v30, 6 }
 0x84b   :  { %577 = vrot.lane.b32.xlu1 %v576_v31, %s3532_s8 }
 0x8bd   :  { %v578_v32 = vpop.permute.xlu1 %577 }
 0x8be   :  { %3010 = vmatmul.mubr.msk.f32.vlgmr.msra.gmra.mrb[4].mxu1 %vm264_vm2, %v578_v32 }
 0x8bf   :  { %3268 = vmatpush3.bf16.msra.mxu1 %v3670_v7  ;;  %3031 = vmatprep.mubr.msk.f32.mxu1 %vm3529_vm1, %v3530_v12 }
 0x8c0   :  { %3269 = vmatprep.subr.bf16.mxu1 %v3528_v8 }
 0x8c3   :  { %3271 = vmatpush3.bf16.msra.mxu1 %v3681_v11 }
 0x8c4   :  { %3278 = vmatprep.subr.bf16.mxu1 %v3528_v8 }
 0x991   :  { %v647_v33 = vpop.f32.mrb[4].mxu1 }
 0x992   :  { %v648_v34 = vadd.f32 %v3710_v21, %v647_v33  ;;  %v3011_v35 = vpop.f32.mrb[5].mxu1 }
 0x994   :  { %v652_v36 = vrot.slane %v648_v34, 2 }
 0x996   :  { %661 = vrot.lane.b32.xlu0 %v652_v36, %s3531_s26  ;;  %v654_v37 = vadd.f32 %v652_v36, %v3725_v29 }
 0x998   :  { %v2775_v38 = vmul.f32 -1.442695, %v654_v37 }
 0x99a   :  { %3414 = vpow2.f32 %v2775_v38 }
 0x9a4   :  { %v3415_v39 = vpop.eup %3414 }
 0x9a5   :  { %v658_v40 = vadd.f32 1.0, %v3415_v39 }
 0x9a7   :  { %3416 = vrcp.f32 %v658_v40 }
 0x9b1   :  { %v3417_v41 = vpop.eup %3416 }
 0x9b2   :  { %v671_v48 = vsub.f32 1.0, %v3417_v41  ;;  %v679_v50 = vmul.f32 %v3417_v41, %v677_v47 }
 0xa08   :  { %v662_v42 = vpop.permute.xlu0 %661 }
 0xa09   :  { %v664_v43 = vmul.f32 %v3417_v41, %v662_v42 }
 0xa0b   :  { %666 = vrot.lane.b32.xlu1 %v664_v43, %s3531_s26 }
 0xa7d   :  { %v667_v44 = vpop.permute.xlu1 %666 }
 0xa7e   :  { %v669_v45 = vadd.f32 %v667_v44, %v3725_v29 }
 0xa80   :  { %3418 = vtanh.f32 %v669_v45 }
 0xa8a   :  { %v3419_v46 = vpop.eup %3418 }
 0xa8b   :  { %673 = vrot.lane.b32.xlu0 %v3419_v46, %s3532_s8 }
 0xafd   :  { %v674_v49 = vpop.permute.xlu0 %673 }
 0xafe   :  { %v676_v51 = vmul.f32 %v674_v49, %v671_v48 }
 0xb00   :  { %v680_v52 = vadd.f32 %v679_v50, %v676_v51 }
 0xb02   :  { %v682_v53 = vrot.slane %v680_v52, 6 }
 0xb04   :  { %683 = vrot.lane.b32.xlu1 %v682_v53, %s3532_s8 }
 0xb76   :  { %v684_v54 = vpop.permute.xlu1 %683 }
 0xb77   :  { %3021 = vmatmul.mubr.msk.f32.vlgmr.msra.gmra.mrb[6].mxu0 %vm264_vm2, %v684_v54 }
 0xb78   :  { %3274 = vmatpush3.bf16.msra.mxu0 %v3670_v7  ;;  %3042 = vmatprep.mubr.msk.f32.mxu0 %vm3529_vm1, %v3530_v12 }
 0xb79   :  { %3275 = vmatprep.subr.bf16.mxu0 %v3528_v8 }
 0xb7c   :  { %3277 = vmatpush3.bf16.msra.mxu0 %v3681_v11 }
 0xc4a   :  { %v753_v29 = vpop.f32.mrb[6].mxu0 }
 0xc4b   :  { %v754_v55 = vadd.f32 %v3710_v21, %v753_v29  ;;  %v3022_v56 = vpop.f32.mrb[7].mxu0 }
 0xc4d   :  { %765 = vrot.lane.b32.xlu0 %v754_v55, %s3531_s26  ;;  %v757_v57 = vadd.f32 %v754_v55, %v3723_v27 }
 0xc4f   :  { %v2777_v58 = vmul.f32 -1.442695, %v757_v57 }
 0xc51   :  { %3420 = vpow2.f32 %v2777_v58 }
 0xc5b   :  { %v3421_v59 = vpop.eup %3420 }
 0xc5c   :  { %v761_v60 = vadd.f32 1.0, %v3421_v59 }
 0xc5e   :  { %3422 = vrcp.f32 %v761_v60 }
 0xc68   :  { %v3423_v61 = vpop.eup %3422 }
 0xc69   :  { %v775_v3 = vsub.f32 1.0, %v3423_v61  ;;  %v782_v5 = vmul.f32 %v3423_v61, %v682_v53 }
 0xcbf   :  { %v766_v62 = vpop.permute.xlu0 %765 }
 0xcc0   :  { %v768_v63 = vmul.f32 %v3423_v61, %v766_v62 }
 0xcc2   :  { %770 = vrot.lane.b32.xlu1 %v768_v63, %s3531_s26 }
 0xd34   :  { %v771_v0 = vpop.permute.xlu1 %770 }
 0xd35   :  { %v773_v1 = vadd.f32 %v771_v0, %v3723_v27 }
 0xd37   :  { %3424 = vtanh.f32 %v773_v1 }
 0xd41   :  { %v3425_v2 = vpop.eup %3424 }
 0xd42   :  { %777 = vrot.lane.b32.xlu0 %v3425_v2, %s3532_s8 }
 0xdb4   :  { %v778_v4 = vpop.permute.xlu0 %777 }
 0xdb5   :  { %v780_v6 = vmul.f32 %v778_v4, %v775_v3 }
 0xdb7   :  { %v783_v9 = vadd.f32 %v782_v5, %v780_v6  ;;  %v1105_v6 = vld [vmem:[%s4209_s10 + $0x18] sm:$0xff] }
 0xdb9   :  { %785 = vrot.lane.b32.xlu1 %v783_v9, %s3532_s8  ;;  %v885_v26 = vrot.slane %v783_v9, 6  ;;  %v1102_v9 = vld [vmem:[%s4209_s10] sm:$0xff] }
 0xe2b   :  { %v786_v10 = vpop.permute.xlu1 %785 }
 0xe2c   :  { %3032 = vmatmul.mubr.msk.f32.vlgmr.msra.gmra.mrb[6].mxu1 %vm264_vm2, %v786_v10 }
 0xe2d   :  { %3280 = vmatpush3.bf16.msra.mxu1 %v3670_v7  ;;  %3053 = vmatprep.mubr.msk.f32.mxu1 %vm3529_vm1, %v3530_v12 }
 0xe2e   :  { %3281 = vmatprep.subr.bf16.mxu1 %v3528_v8 }
 0xe31   :  { %3283 = vmatpush3.bf16.msra.mxu1 %v3681_v11 }
 0xe32   :  { %3292 = vmatprep.subr.bf16.mxu1 %v3528_v8 }
 0xeff   :  { %v855_v13 = vpop.f32.mrb[6].mxu1 }
 0xf00   :  { %v856_v14 = vadd.f32 %v3710_v21, %v855_v13  ;;  %v3033_v15 = vpop.f32.mrb[7].mxu1  ;;  %v1104_v13 = vld [vmem:[%s4209_s10 + $0x10] sm:$0xff] }
 0xf01   :  { %v3286_v15 = vpack.c.bf16 %v1104_v13, %v1102_v9 }
 0xf02   :  { %v860_v16 = vrot.slane %v856_v14, 6  ;;  %v1307_v14 = vld [vmem:[%s4238_s5 + $0x8] sm:$0xff] }
 0xf04   :  { %869 = vrot.lane.b32.xlu0 %v860_v16, %s3531_s26  ;;  %v862_v17 = vadd.f32 %v860_v16, %v3723_v27 }
 0xf06   :  { %v2779_v18 = vmul.f32 -1.442695, %v862_v17  ;;  %v1107_v17 = vld [vmem:[%s4209_s10 + $0x28] sm:$0xff] }
 0xf08   :  { %3426 = vpow2.f32 %v2779_v18  ;;  %v1109_v18 = vld [vmem:[%s4209_s10 + $0x38] sm:$0xff] }
 0xf12   :  { %v3427_v7 = vpop.eup %3426 }
 0xf13   :  { %v866_v19 = vadd.f32 1.0, %v3427_v7  ;;  %v1106_v7 = vld [vmem:[%s4209_s10 + $0x20] sm:$0xff] }
 0xf15   :  { %3428 = vrcp.f32 %v866_v19  ;;  %v3288_v19 = vpack.c.bf16 %v1109_v18, %v1107_v17 }
 0xf1f   :  { %v3429_v20 = vpop.eup %3428 }
 0xf20   :  { %v879_v28 = vsub.f32 1.0, %v3429_v20  ;;  %v887_v32 = vmul.f32 %v3429_v20, %v885_v26  ;;  %v1467_v26 = vld [vmem:[%s4211_s12 + $0x8] sm:$0xff] }
 0xf76   :  { %v870_v22 = vpop.permute.xlu0 %869 }
 0xf77   :  { %v872_v23 = vmul.f32 %v3429_v20, %v870_v22  ;;  %v1108_v20 = vld [vmem:[%s4209_s10 + $0x30] sm:$0xff] }
 0xf78   :  { %v1308_v22 = vld [vmem:[%s4238_s5 + $0x10] sm:$0xff] }
 0xf79   :  { %874 = vrot.lane.b32.xlu1 %v872_v23, %s3531_s26  ;;  %v1309_v23 = vld [vmem:[%s4238_s5 + $0x18] sm:$0xff] }
 0xfeb   :  { %v875_v11 = vpop.permute.xlu1 %874 }
 0xfec   :  { %v877_v24 = vadd.f32 %v875_v11, %v3723_v27  ;;  %v3290_v11 = vpack.c.bf16 %v1108_v20, %v1106_v7 }
 0xfee   :  { %3430 = vtanh.f32 %v877_v24  ;;  %v3296_v24 = vpack.c.bf16 %v1309_v23, %v1308_v22 }
 0xff8   :  { %v3431_v25 = vpop.eup %3430 }
 0xff9   :  { %881 = vrot.lane.b32.xlu0 %v3431_v25, %s3532_s8  ;;  %v1466_v25 = vld [vmem:[%s4211_s12] sm:$0xff] }
0x106b   :  { %v882_v30 = vpop.permute.xlu0 %881 }
0x106c   :  { %v884_v31 = vmul.f32 %v882_v30, %v879_v28  ;;  %v3304_v28 = vpack.c.bf16 %v1467_v26, %v1466_v25 }
0x106e   :  { %v888_v33 = vadd.f32 %v887_v32, %v884_v31 }
0x1070   :  { %v890_v34 = vrot.slane %v888_v33, 2  ;;  %v991_v50 = vrot.slane %v888_v33, 6 }
0x1072   :  { %891 = vrot.lane.b32.xlu1 %v890_v34, %s3532_s8 }
0x10e4   :  { %v892_v35 = vpop.permute.xlu1 %891 }
0x10e5   :  { %3043 = vmatmul.mubr.msk.f32.vlgmr.msra.gmra.mrb[8].mxu0 %vm264_vm2, %v892_v35 }
0x10e6   :  { %1180 = vmatprep.mubr.f32.mxu0 %v3530_v12 }
0x11b8   :  { %v961_v36 = vpop.f32.mrb[8].mxu0 }
0x11b9   :  { %v962_v37 = vadd.f32 %v3710_v21, %v961_v36  ;;  %v3044_v38 = vpop.f32.mrb[9].mxu0 }
0x11bb   :  { %v966_v39 = vrot.slane %v962_v37, 4 }
0x11bd   :  { %975 = vrot.lane.b32.xlu0 %v966_v39, %s3531_s26  ;;  %v968_v40 = vadd.f32 %v966_v39, %v3723_v27  ;;  %v2795_v39 = vld [vmem:[%s4238_s5 + $0x20] sm:$0xff] }
0x11bf   :  { %v2781_v41 = vmul.f32 -1.442695, %v968_v40  ;;  %v2796_v40 = vld [vmem:[%s4238_s5 + $0x28] sm:$0xff] }
0x11c1   :  { %3432 = vpow2.f32 %v2781_v41  ;;  %v3299_v41 = vpack.c.bf16 %v2796_v40, %v2795_v39 }
0x11cb   :  { %v3433_v42 = vpop.eup %3432 }
0x11cc   :  { %v972_v43 = vadd.f32 1.0, %v3433_v42  ;;  %v2797_v42 = vld [vmem:[%s4238_s5 + $0x30] sm:$0xff] }
0x11ce   :  { %3434 = vrcp.f32 %v972_v43  ;;  %v2798_v43 = vld [vmem:[%s4238_s5 + $0x38] sm:$0xff] }
0x11d8   :  { %v3435_v44 = vpop.eup %3434 }
0x11d9   :  { %v985_v51 = vsub.f32 1.0, %v3435_v44  ;;  %v993_v53 = vmul.f32 %v3435_v44, %v991_v50 }
0x122f   :  { %v976_v45 = vpop.permute.xlu0 %975 }
0x1230   :  { %v978_v46 = vmul.f32 %v3435_v44, %v976_v45  ;;  %v1464_v45 = vld [vmem:[%s4239_s4] sm:$0xff] }
0x1232   :  { %980 = vrot.lane.b32.xlu1 %v978_v46, %s3531_s26  ;;  %v3302_v46 = vpack.c.bf16 %v2798_v43, %v2797_v42 }
0x12a4   :  { %v981_v47 = vpop.permute.xlu1 %980 }
0x12a5   :  { %v983_v48 = vadd.f32 %v981_v47, %v3723_v27  ;;  %v1465_v47 = vld [vmem:[%s4239_s4 + $0x8] sm:$0xf] }
0x12a7   :  { %3436 = vtanh.f32 %v983_v48  ;;  %v1648_v48 = vld [vmem:[%s4214_s15] sm:$0xff] }
0x12b1   :  { %v3437_v49 = vpop.eup %3436 }
0x12b2   :  { %987 = vrot.lane.b32.xlu0 %v3437_v49, %s3532_s8  ;;  %v1649_v49 = vld [vmem:[%s4214_s15 + $0x8] sm:$0xff] }
0x12b3   :  { %v3896_v50 = vpack.c.bf16 %v1649_v49, %v1648_v48 }
0x1324   :  { %v988_v52 = vpop.permute.xlu0 %987 }
0x1325   :  { %v990_v54 = vmul.f32 %v988_v52, %v985_v51  ;;  %v1650_v51 = vld [vmem:[%s4214_s15 + $0x10] sm:$0xff]  ;;  %v1651_v52 = vld [vmem:[%s4214_s15 + $0x18] sm:$0xff] }
0x1327   :  { %v994_v29 = vadd.f32 %v993_v53, %v990_v54  ;;  %v3907_v54 = vpack.c.bf16 %v1651_v52, %v1650_v51 }
0x1329   :  { %v996_v55 = vrot.slane %v994_v29, 4  ;;  %v1097_v31 = vrot.slane %v994_v29, 6  ;;  %v3915_v29 = vld [vmem:[%s4240_s3] sm:$0x3] }
0x132b   :  { %997 = vrot.lane.b32.xlu1 %v996_v55, %s3532_s8 }
0x139d   :  { %v998_v56 = vpop.permute.xlu1 %997 }
0x139e   :  { %3054 = vmatmul.mubr.msk.f32.vlgmr.msra.gmra.mrb[8].mxu1 %vm264_vm2, %v998_v56  ;;  %v1556_v56 = vld [vmem:[%s4213_s14] sm:$0xff] }
0x139f   :  { %3064 = vmatprep.mubr.msk.f32.mxu1 %vm3529_vm1, %v3530_v12 }
0x1471   :  { %v1067_v57 = vpop.f32.mrb[8].mxu1 }
0x1472   :  { %v1068_v58 = vadd.f32 %v3710_v21, %v1067_v57  ;;  %v3055_v59 = vpop.f32.mrb[9].mxu1  ;;  %v1103_v21 = vld [vmem:[%s4209_s10 + $0x8] sm:$0xff] }
0x1473   :  { %v3284_v10 = vpack.c.bf16 %v1105_v6, %v1103_v21  ;;  %v1557_v57 = vld [vmem:[%s4213_s14 + $0x8] sm:$0xff]  ;;  %v1558_v59 = vld [vmem:[%s4213_s14 + $0x10] sm:$0xff] }
0x1474   :  { %v1072_v60 = vrot.slane %v1068_v58, 2  ;;  %v3308_v58 = vpack.c.bf16 %v1557_v57, %v1556_v56 }
0x1475   :  { %3285 = vmatprep.subr.bf16.mxu0 %v3284_v10  ;;  %v3954_v10 = vld [vmem:[%s4216_s17] ss:$0 sm:$0xff]  ;;  %s3533_s17 = smov 32  }
0x1476   :  { %1081 = vrot.lane.b32.xlu0 %v1072_v60, %s3531_s26  ;;  %v1074_v61 = vadd.f32 %v1072_v60, %v3723_v27  ;;  %3287 = vmatpush1.bf16.msra.mxu0 %v3286_v15  ;;  %v1559_v60 = vld [vmem:[%s4213_s14 + $0x18] sm:$0xff]  ;;  %v2803_v15 = vld [vmem:[%s4215_s16] ss:$0 sm:$0xff] }
0x1477   :  { %3289 = vmatprep.subr.bf16.mxu0 %v3288_v19 }
0x1478   :  { %v2783_v62 = vmul.f32 -1.442695, %v1074_v61  ;;  %v3312_v61 = vpack.c.bf16 %v1559_v60, %v1558_v59 }
0x147a   :  { %3438 = vpow2.f32 %v2783_v62  ;;  %3291 = vmatpush1.bf16.msra.mxu0 %v3290_v11 }
0x147b   :  { %3298 = vmatprep.subr.bf16.mxu0 %v3528_v8 }
0x1484   :  { %v3439_v63 = vpop.eup %3438 }
0x1485   :  { %v1078_v0 = vadd.f32 1.0, %v3439_v63 }
0x1487   :  { %3440 = vrcp.f32 %v1078_v0 }
0x1491   :  { %v3441_v1 = vpop.eup %3440 }
0x1492   :  { %v1091_v32 = vsub.f32 1.0, %v3441_v1  ;;  %v1099_v34 = vmul.f32 %v3441_v1, %v1097_v31  ;;  %v1654_v31 = vld [vmem:[%s4217_s18 + $0x8] sm:$0xff] }
0x14e8   :  { %v1082_v2 = vpop.permute.xlu0 %1081 }
0x14e9   :  { %v1084_v3 = vmul.f32 %v3441_v1, %v1082_v2  ;;  %v2800_v2 = vld [vmem:[%s4212_s13] ss:$0 sm:$0xff] }
0x14eb   :  { %1086 = vrot.lane.b32.xlu1 %v1084_v3, %s3531_s26 }
0x155d   :  { %v1087_v4 = vpop.permute.xlu1 %1086 }
0x155e   :  { %v1089_v5 = vadd.f32 %v1087_v4, %v3723_v27  ;;  %v1306_v27 = vld [vmem:[%s4238_s5] sm:$0xff] }
0x155f   :  { %v3293_v16 = vpack.c.bf16 %v1307_v14, %v1306_v27 }
0x1560   :  { %3442 = vtanh.f32 %v1089_v5 }
0x1561   :  { %3294 = vmatpush3.bf16.msra.mxu1 %v3293_v16 }
0x1562   :  { %3295 = vmatprep.subr.bf16.mxu1 %v3528_v8 }
0x1565   :  { %3297 = vmatpush3.bf16.msra.mxu1 %v3296_v24 }
0x1566   :  { %3305 = vmatprep.subr.bf16.mxu1 %v3304_v28 }
0x156a   :  { %v3443_v30 = vpop.eup %3442 }
0x156b   :  { %1093 = vrot.lane.b32.xlu0 %v3443_v30, %s3532_s8  ;;  %v1653_v30 = vld [vmem:[%s4217_s18] sm:$0xff] }
0x15dd   :  { %v1094_v33 = vpop.permute.xlu0 %1093 }
0x15de   :  { %v1096_v35 = vmul.f32 %v1094_v33, %v1091_v32  ;;  %v1655_v32 = vld [vmem:[%s4217_s18 + $0x10] sm:$0xff]  ;;  %v3978_v33 = vpack.c.bf16 %v1654_v31, %v1653_v30 }
0x15e0   :  { %v1100_v36 = vadd.f32 %v1099_v34, %v1096_v35  ;;  %v1656_v34 = vld [vmem:[%s4217_s18 + $0x18] sm:$0xff] }
0x15e1   :  { %v3984_v35 = vpack.c.bf16 %v1656_v34, %v1655_v32 }
0x15e2   :  { %v1386_v37 = vrot.slane %v1100_v36, 7  ;;  %v1111_v38 = vrot.slane %v1100_v36, 6 }
0x15e4   :  { %1387 = vrot.lane.b32.xlu0 %v1386_v37, %s3532_s8  ;;  %1112 = vrot.lane.b32.xlu1 %v1111_v38, %s3532_s8 }
0x1656   :  { %v1113_v44 = vpop.permute.xlu1 %1112  ;;  %v1388_v53 = vpop.permute.xlu0 %1387 }
0x1657   :  { %2784 = vmatmul.mubr.msk.f32.vlgmr.msra.gmra.mrb[10].mxu0 %vm264_vm2, %v1113_v44  ;;  %3065 = vmatmul.mubr.msk.f32.vlgmr.msra.gmra.mrb[10].mxu1 %vm264_vm2, %v1113_v44  ;;  %v1463_v55 = vadd.f32 %v1113_v44, %v3915_v29  ;;  %v4008_v44 = vld [vmem:[%s4218_s19] ss:$0 sm:$0xff] }
0x1658   :  { %3300 = vmatpush3.bf16.msra.mxu0 %v3299_v41  ;;  %3307 = vmatpush3.bf16.msra.mxu1 %v3304_v28 }
0x1659   :  { %3301 = vmatprep.subr.bf16.mxu0 %v3528_v8  ;;  %3082 = vmatprep.mubr.msk.f32.mxu1 %vm81_vm0, %v1464_v45 }
0x165a   :  { %3075 = vmatprep.mubr.msk.f32.mxu0 %vm3529_vm1, %v3530_v12  ;;  %3309 = vmatprep.subr.bf16.mxu1 %v3308_v58 }
0x165b   :  { %3083 = vmatmul.mubr.msk.f32.vlgmr.msra.gmra.mrb[12].mxu1 %vm81_vm0, %v1465_v47 }
0x165c   :  { %3303 = vmatpush3.bf16.msra.mxu0 %v3302_v46  ;;  %3311 = vmatpush3.bf16.msra.mxu1 %v3308_v58 }
0x165d   :  { %3316 = vmatprep.subr.bf16.mxu0 %v3528_v8  ;;  %3313 = vmatprep.subr.bf16.mxu1 %v3312_v61 }
0x165f   :  { %3076 = vmatmul.mubr.msk.f32.vlgmr.msra.gmra.mrb[12].mxu0 %vm264_vm2, %v1388_v53 }
0x1660   :  { %3318 = vmatpush3.bf16.msra.mxu0 %v3896_v50  ;;  %3104 = vmatprep.mubr.msk.f32.mxu0 %vm3529_vm1, %v3530_v12 }
0x1661   :  { %3319 = vmatprep.subr.bf16.mxu0 %v3528_v8  ;;  %3315 = vmatpush3.bf16.msra.mxu1 %v3312_v61 }
0x1662   :  { %3322 = vmatprep.subr.bf16.mxu1 %v3528_v8 }
0x1664   :  { %3321 = vmatpush3.bf16.msra.mxu0 %v3907_v54 }
0x1665   :  { %3328 = vmatprep.subr.bf16.mxu0 %v3528_v8 }
0x1667   :  { %3105 = vmatmul.mubr.msk.f32.vlgmr.msra.gmra.mrb[14].mxu0 %vm264_vm2, %v1463_v55 }
0x1668   :  { %3330 = vmatpush3.bf16.msra.mxu0 %v3896_v50  ;;  %3126 = vmatprep.mubr.msk.f32.mxu0 %vm3529_vm1, %v3530_v12 }
0x1669   :  { %3331 = vmatprep.subr.bf16.mxu0 %v3528_v8 }
0x166c   :  { %3333 = vmatpush3.bf16.msra.mxu0 %v3907_v54 }
0x166d   :  { %3340 = vmatprep.subr.bf16.mxu0 %v3528_v8 }
0x172a   :  { %v3940_v62 = vpop.f32.mrb[10].mxu0  ;;  %v1376_v63 = vpop.f32.mrb[10].mxu1 }
0x172b   :  { %1380 = vst [vmem:[#allocation4] sm:$0x1] %v1376_v63  ;;  %v3942_v0 = vpop.f32.mrb[11].mxu0  ;;  %v3066_v1 = vpop.f32.mrb[11].mxu1 }
0x172e   :  { %v3084_v3 = vpop.f32.mrb[12].mxu1 }
0x172f   :  { %v1547_v4 = vpop.f32.mrb[13].mxu1  ;;  %v1553_v21 = vadd.f32 %v3084_v3, %v2800_v2 }
0x1730   :  { %v1548_v5 = vadd.f32 %v2800_v2, %v1547_v4 }
0x1732   :  { %v1457_v6 = vpop.f32.mrb[12].mxu0  ;;  %3093 = vmatprep.mubr.msk.f32.mxu1 %vm264_vm2, %v1548_v5 }
0x1733   :  { %1461 = vst [vmem:[#allocation4 + $0x1] sm:$0x1] %v1457_v6  ;;  %v3077_v9 = vpop.f32.mrb[13].mxu0  ;;  %3094 = vmatmul.mubr.msk.f32.vlgmr.msra.gmra.mrb[14].mxu1 %vm264_vm2, %v1553_v21 }
0x1734   :  { %3115 = vmatprep.mubr.msk.f32.mxu1 %vm3529_vm1, %v3530_v12  ;;  %3324 = vmatpush3.bf16.msra.mxu1 %v3978_v33 }
0x1735   :  { %3325 = vmatprep.subr.bf16.mxu1 %v3528_v8 }
0x1738   :  { %3327 = vmatpush3.bf16.msra.mxu1 %v3984_v35 }
0x1739   :  { %3334 = vmatprep.subr.bf16.mxu1 %v3528_v8 }
0x173a   :  { %v1733_v13 = vpop.f32.mrb[14].mxu0 }
0x173b   :  { %v1734_v27 = vadd.f32 %v3954_v10, %v1733_v13  ;;  %v3106_v14 = vpop.f32.mrb[15].mxu0 }
0x173d   :  { %1745 = vrot.lane.b32.xlu1 %v1734_v27, %s3531_s26 }
0x17af   :  { %v1746_v24 = vpop.permute.xlu1 %1745 }
0x1806   :  { %v3095_v16 = vpop.f32.mrb[14].mxu1 }
0x1807   :  { %v3961_v17 = vadd.f32 %v3095_v16, %v2803_v15  ;;  %v1639_v18 = vpop.f32.mrb[15].mxu1 }
0x1808   :  { %v3963_v7 = vadd.f32 %v2803_v15, %v1639_v18 }
0x180a   :  { %v1737_v19 = vadd.f32 %v1734_v27, %v3963_v7 }
0x180c   :  { %v2808_v20 = vmul.f32 -1.442695, %v1737_v19 }
0x180e   :  { %3444 = vpow2.f32 %v2808_v20 }
0x1818   :  { %v3445_v22 = vpop.eup %3444 }
0x1819   :  { %v1741_v23 = vadd.f32 1.0, %v3445_v22 }
0x181b   :  { %3446 = vrcp.f32 %v1741_v23 }
0x1825   :  { %v3447_v11 = vpop.eup %3446 }
0x1826   :  { %v1748_v25 = vmul.f32 %v3447_v11, %v1746_v24  ;;  %v1755_v38 = vsub.f32 1.0, %v3447_v11 }
0x1828   :  { %1750 = vrot.lane.b32.xlu0 %v1748_v25, %s3531_s26 }
0x182c   :  { %1761 = vrot.lane.b32.xlu0 %v1463_v55, %s3533_s17 }
0x189a   :  { %v1751_v26 = vpop.permute.xlu0 %1750 }
0x189b   :  { %v1753_v28 = vadd.f32 %v1751_v26, %v3963_v7 }
0x189d   :  { %3448 = vtanh.f32 %v1753_v28 }
0x189e   :  { %v1762_v37 = vpop.permute.xlu0 %1761 }
0x189f   :  { %v1764_v40 = vmul.f32 %v3447_v11, %v1762_v37 }
0x18a7   :  { %v3449_v36 = vpop.eup %3448 }
0x18a8   :  { %1757 = vrot.lane.b32.xlu1 %v3449_v36, %s3532_s8 }
0x191a   :  { %v1758_v39 = vpop.permute.xlu1 %1757 }
0x191b   :  { %v1760_v41 = vmul.f32 %v1758_v39, %v1755_v38 }
0x191d   :  { %v1765_v42 = vadd.f32 %v1764_v40, %v1760_v41 }
0x191f   :  { %1773 = vrot.lane.b32.xlu1 %v1765_v42, %s3532_s8  ;;  %v1945_v2 = vrot.slane %v1765_v42, 6 }
0x1991   :  { %v1774_v43 = vpop.permute.xlu1 %1773 }
0x1992   :  { %3116 = vmatmul.mubr.msk.f32.vlgmr.msra.gmra.mrb[16].mxu1 %vm264_vm2, %v1774_v43  ;;  %3127 = vmatmul.mubr.msk.f32.vlgmr.msra.gmra.mrb[16].mxu0 %vm264_vm2, %v1774_v43 }
0x1993   :  { %3336 = vmatpush3.bf16.msra.mxu1 %v3978_v33  ;;  %3342 = vmatpush3.bf16.msra.mxu0 %v3896_v50 }
0x1994   :  { %3337 = vmatprep.subr.bf16.mxu1 %v3528_v8  ;;  %3343 = vmatprep.subr.bf16.mxu0 %v3528_v8 }
0x1995   :  { %3137 = vmatprep.mubr.msk.f32.mxu1 %vm3529_vm1, %v3530_v12  ;;  %3148 = vmatprep.mubr.msk.f32.mxu0 %vm3529_vm1, %v3530_v12 }
0x1997   :  { %3339 = vmatpush3.bf16.msra.mxu1 %v3984_v35  ;;  %3345 = vmatpush3.bf16.msra.mxu0 %v3907_v54 }
0x1998   :  { %3346 = vmatprep.subr.bf16.mxu1 %v3528_v8  ;;  %3352 = vmatprep.subr.bf16.mxu0 %v3528_v8 }
0x1a65   :  { %v1843_v45 = vpop.f32.mrb[16].mxu1  ;;  %v1915_v46 = vpop.f32.mrb[16].mxu0 }
0x1a66   :  { %v1844_v47 = vadd.f32 %v4008_v44, %v1843_v45  ;;  %v1916_v48 = vadd.f32 %v3954_v10, %v1915_v46  ;;  %v3117_v49 = vpop.f32.mrb[17].mxu1  ;;  %v3128_v51 = vpop.f32.mrb[17].mxu0 }
0x1a68   :  { %1848 = vst.msk [vmem:[%s4221_s22] sm:$0x3] %vm1847_vm3, %v1844_v47  ;;  %v1920_v52 = vrot.slane %v1916_v48, 6 }
0x1a6a   :  { %1929 = vrot.lane.b32.xlu0 %v1920_v52, %s3531_s26  ;;  %v1922_v53 = vadd.f32 %v1920_v52, %v3963_v7 }
0x1a6c   :  { %v2812_v55 = vmul.f32 -1.442695, %v1922_v53 }
0x1a6e   :  { %3450 = vpow2.f32 %v2812_v55 }
0x1a78   :  { %v3451_v56 = vpop.eup %3450 }
0x1a79   :  { %v1926_v57 = vadd.f32 1.0, %v3451_v56 }
0x1a7b   :  { %3452 = vrcp.f32 %v1926_v57 }
0x1a85   :  { %v3453_v58 = vpop.eup %3452 }
0x1a86   :  { %v1939_v3 = vsub.f32 1.0, %v3453_v58  ;;  %v1947_v5 = vmul.f32 %v3453_v58, %v1945_v2 }
0x1adc   :  { %v1930_v59 = vpop.permute.xlu0 %1929 }
0x1add   :  { %v1932_v60 = vmul.f32 %v3453_v58, %v1930_v59 }
0x1adf   :  { %1934 = vrot.lane.b32.xlu1 %v1932_v60, %s3531_s26 }
0x1b51   :  { %v1935_v61 = vpop.permute.xlu1 %1934 }
0x1b52   :  { %v1937_v63 = vadd.f32 %v1935_v61, %v3963_v7 }
0x1b54   :  { %3454 = vtanh.f32 %v1937_v63 }
0x1b5e   :  { %v3455_v1 = vpop.eup %3454 }
0x1b5f   :  { %1941 = vrot.lane.b32.xlu0 %v3455_v1, %s3532_s8 }
0x1bd1   :  { %v1942_v4 = vpop.permute.xlu0 %1941 }
0x1bd2   :  { %v1944_v21 = vmul.f32 %v1942_v4, %v1939_v3 }
0x1bd4   :  { %v1948_v6 = vadd.f32 %v1947_v5, %v1944_v21 }
0x1bd6   :  { %v1950_v9 = vrot.slane %v1948_v6, 2  ;;  %v2122_v34 = vrot.slane %v1948_v6, 6 }
0x1bd8   :  { %1951 = vrot.lane.b32.xlu1 %v1950_v9, %s3532_s8 }
0x1c4a   :  { %v1952_v13 = vpop.permute.xlu1 %1951 }
0x1c4b   :  { %3138 = vmatmul.mubr.msk.f32.vlgmr.msra.gmra.mrb[18].mxu1 %vm264_vm2, %v1952_v13  ;;  %3149 = vmatmul.mubr.msk.f32.vlgmr.msra.gmra.mrb[18].mxu0 %vm264_vm2, %v1952_v13 }
0x1c4c   :  { %3348 = vmatpush3.bf16.msra.mxu1 %v3978_v33  ;;  %3354 = vmatpush3.bf16.msra.mxu0 %v3896_v50 }
0x1c4d   :  { %3349 = vmatprep.subr.bf16.mxu1 %v3528_v8  ;;  %3355 = vmatprep.subr.bf16.mxu0 %v3528_v8 }
0x1c4e   :  { %3159 = vmatprep.mubr.msk.f32.mxu1 %vm3529_vm1, %v3530_v12  ;;  %3170 = vmatprep.mubr.msk.f32.mxu0 %vm3529_vm1, %v3530_v12 }
0x1c50   :  { %3351 = vmatpush3.bf16.msra.mxu1 %v3984_v35  ;;  %3357 = vmatpush3.bf16.msra.mxu0 %v3907_v54 }
0x1c51   :  { %3358 = vmatprep.subr.bf16.mxu1 %v3528_v8  ;;  %3364 = vmatprep.subr.bf16.mxu0 %v3528_v8 }
0x1d1e   :  { %v2021_v27 = vpop.f32.mrb[18].mxu1  ;;  %v2092_v14 = vpop.f32.mrb[18].mxu0 }
0x1d1f   :  { %v2022_v15 = vadd.f32 %v4008_v44, %v2021_v27  ;;  %v2093_v16 = vadd.f32 %v3954_v10, %v2092_v14  ;;  %v3139_v18 = vpop.f32.mrb[19].mxu1  ;;  %v3150_v19 = vpop.f32.mrb[19].mxu0 }
0x1d21   :  { %2025 = vst.msk [vmem:[%s4221_s22 + $0x2] sm:$0x3] %vm1847_vm3, %v2022_v15  ;;  %v2097_v20 = vrot.slane %v2093_v16, 4 }
0x1d23   :  { %2106 = vrot.lane.b32.xlu0 %v2097_v20, %s3531_s26  ;;  %v2099_v22 = vadd.f32 %v2097_v20, %v3963_v7 }
0x1d25   :  { %v2815_v23 = vmul.f32 -1.442695, %v2099_v22 }
0x1d27   :  { %3456 = vpow2.f32 %v2815_v23 }
0x1d31   :  { %v3457_v11 = vpop.eup %3456 }
0x1d32   :  { %v2103_v24 = vadd.f32 1.0, %v3457_v11 }
0x1d34   :  { %3458 = vrcp.f32 %v2103_v24 }
0x1d3e   :  { %v3459_v25 = vpop.eup %3458 }
0x1d3f   :  { %v2116_v36 = vsub.f32 1.0, %v3459_v25  ;;  %v2124_v38 = vmul.f32 %v3459_v25, %v2122_v34 }
0x1d95   :  { %v2107_v26 = vpop.permute.xlu0 %2106 }
0x1d96   :  { %v2109_v28 = vmul.f32 %v3459_v25, %v2107_v26 }
0x1d98   :  { %2111 = vrot.lane.b32.xlu1 %v2109_v28, %s3531_s26 }
0x1e0a   :  { %v2112_v30 = vpop.permute.xlu1 %2111 }
0x1e0b   :  { %v2114_v31 = vadd.f32 %v2112_v30, %v3963_v7 }
0x1e0d   :  { %3460 = vtanh.f32 %v2114_v31 }
0x1e17   :  { %v3461_v32 = vpop.eup %3460 }
0x1e18   :  { %2118 = vrot.lane.b32.xlu0 %v3461_v32, %s3532_s8 }
0x1e8a   :  { %v2119_v37 = vpop.permute.xlu0 %2118 }
0x1e8b   :  { %v2121_v39 = vmul.f32 %v2119_v37, %v2116_v36 }
0x1e8d   :  { %v2125_v40 = vadd.f32 %v2124_v38, %v2121_v39 }
0x1e8f   :  { %v2127_v41 = vrot.slane %v2125_v40, 4  ;;  %v2299_v1 = vrot.slane %v2125_v40, 6 }
0x1e91   :  { %2128 = vrot.lane.b32.xlu1 %v2127_v41, %s3532_s8 }
0x1f03   :  { %v2129_v42 = vpop.permute.xlu1 %2128 }
0x1f04   :  { %3160 = vmatmul.mubr.msk.f32.vlgmr.msra.gmra.mrb[20].mxu1 %vm264_vm2, %v2129_v42  ;;  %3171 = vmatmul.mubr.msk.f32.vlgmr.msra.gmra.mrb[20].mxu0 %vm264_vm2, %v2129_v42 }
0x1f05   :  { %3360 = vmatpush3.bf16.msra.mxu1 %v3978_v33  ;;  %3366 = vmatpush3.bf16.msra.mxu0 %v3896_v50 }
0x1f06   :  { %3361 = vmatprep.subr.bf16.mxu1 %v3528_v8  ;;  %3367 = vmatprep.subr.bf16.mxu0 %v3528_v8 }
0x1f07   :  { %3181 = vmatprep.mubr.msk.f32.mxu1 %vm3529_vm1, %v3530_v12  ;;  %3192 = vmatprep.mubr.msk.f32.mxu0 %vm3529_vm1, %v3530_v12 }
0x1f09   :  { %3363 = vmatpush3.bf16.msra.mxu1 %v3984_v35  ;;  %3369 = vmatpush3.bf16.msra.mxu0 %v3907_v54 }
0x1f0a   :  { %3370 = vmatprep.subr.bf16.mxu1 %v3528_v8  ;;  %3376 = vmatprep.subr.bf16.mxu0 %v3528_v8 }
0x1fd7   :  { %v2198_v43 = vpop.f32.mrb[20].mxu1  ;;  %v2269_v45 = vpop.f32.mrb[20].mxu0 }
0x1fd8   :  { %v2199_v46 = vadd.f32 %v4008_v44, %v2198_v43  ;;  %v2270_v47 = vadd.f32 %v3954_v10, %v2269_v45  ;;  %v3161_v48 = vpop.f32.mrb[21].mxu1  ;;  %v3172_v49 = vpop.f32.mrb[21].mxu0 }
0x1fda   :  { %2202 = vst.msk [vmem:[%s4221_s22 + $0x4] sm:$0x3] %vm1847_vm3, %v2199_v46  ;;  %v2274_v51 = vrot.slane %v2270_v47, 2 }
0x1fdc   :  { %2283 = vrot.lane.b32.xlu0 %v2274_v51, %s3531_s26  ;;  %v2276_v52 = vadd.f32 %v2274_v51, %v3963_v7 }
0x1fde   :  { %v2818_v53 = vmul.f32 -1.442695, %v2276_v52 }
0x1fe0   :  { %3462 = vpow2.f32 %v2818_v53 }
0x1fea   :  { %v3463_v55 = vpop.eup %3462 }
0x1feb   :  { %v2280_v56 = vadd.f32 1.0, %v3463_v55 }
0x1fed   :  { %3464 = vrcp.f32 %v2280_v56 }
0x1ff7   :  { %v3465_v57 = vpop.eup %3464 }
0x1ff8   :  { %v2293_v2 = vsub.f32 1.0, %v3465_v57  ;;  %v2301_v4 = vmul.f32 %v3465_v57, %v2299_v1 }
0x204e   :  { %v2284_v58 = vpop.permute.xlu0 %2283 }
0x204f   :  { %v2286_v59 = vmul.f32 %v3465_v57, %v2284_v58 }
0x2051   :  { %2288 = vrot.lane.b32.xlu1 %v2286_v59, %s3531_s26 }
0x20c3   :  { %v2289_v60 = vpop.permute.xlu1 %2288 }
0x20c4   :  { %v2291_v61 = vadd.f32 %v2289_v60, %v3963_v7 }
0x20c6   :  { %3466 = vtanh.f32 %v2291_v61  ;;  %v1189_v61 = vmul.f32 %v3940_v62, %v3915_v29 }
0x20d0   :  { %v3467_v63 = vpop.eup %3466 }
0x20d1   :  { %2295 = vrot.lane.b32.xlu0 %v3467_v63, %s3532_s8  ;;  %v1191_v63 = vsel %vm1190_vm4, %v1189_v61, 0.0 }
0x2143   :  { %v2296_v3 = vpop.permute.xlu0 %2295 }
0x2144   :  { %v2298_v5 = vmul.f32 %v2296_v3, %v2293_v2 }
0x2146   :  { %v2302_v21 = vadd.f32 %v2301_v4, %v2298_v5 }
0x2148   :  { %v2304_v6 = vrot.slane %v2302_v21, 6 }
0x214a   :  { %2305 = vrot.lane.b32.xlu1 %v2304_v6, %s3532_s8 }
0x21bc   :  { %v2306_v9 = vpop.permute.xlu1 %2305 }
0x21bd   :  { %3182 = vmatmul.mubr.msk.f32.vlgmr.msra.gmra.mrb[22].mxu1 %vm264_vm2, %v2306_v9  ;;  %3193 = vmatmul.mubr.msk.f32.vlgmr.msra.gmra.mrb[22].mxu0 %vm264_vm2, %v2306_v9 }
0x21be   :  { %3372 = vmatpush3.bf16.msra.mxu1 %v3978_v33  ;;  %3378 = vmatpush3.bf16.msra.mxu0 %v3896_v50 }
0x21bf   :  { %3373 = vmatprep.subr.bf16.mxu1 %v3528_v8  ;;  %3379 = vmatprep.subr.bf16.mxu0 %v3528_v8 }
0x21c0   :  { %3203 = vmatprep.mubr.msk.f32.mxu1 %vm3529_vm1, %v3530_v12  ;;  %3214 = vmatprep.mubr.msk.f32.mxu0 %vm3529_vm1, %v3530_v12 }
0x21c2   :  { %3375 = vmatpush3.bf16.msra.mxu1 %v3984_v35  ;;  %3381 = vmatpush3.bf16.msra.mxu0 %v3907_v54 }
0x21c3   :  { %3382 = vmatprep.subr.bf16.mxu1 %v3528_v8 }
0x2290   :  { %v2375_v7 = vpop.f32.mrb[22].mxu1  ;;  %v2446_v13 = vpop.f32.mrb[22].mxu0 }
0x2291   :  { %v2376_v50 = vadd.f32 %v4008_v44, %v2375_v7  ;;  %v2447_v27 = vadd.f32 %v3954_v10, %v2446_v13  ;;  %v3183_v14 = vpop.f32.mrb[23].mxu1  ;;  %v3194_v15 = vpop.f32.mrb[23].mxu0 }
0x2293   :  { %2379 = vst.msk [vmem:[%s4221_s22 + $0x6] sm:$0x3] %vm1847_vm3, %v2376_v50  ;;  %2458 = vrot.lane.b32.xlu0 %v2447_v27, %s3531_s26  ;;  %v2450_v16 = vadd.f32 %v2447_v27, %v3961_v17 }
0x2295   :  { %v2821_v54 = vmul.f32 -1.442695, %v2450_v16  ;;  %v1187_v16 = vlaneseq }
0x2297   :  { %3468 = vpow2.f32 %v2821_v54  ;;  %v4143_v54 = vand.u32 127, %v1187_v16 }
0x2299   :  { %vm1194_vm5 = vcmp.eq.s32.totalorder %v4143_v54, 0  ;;  %vm1211_vm6 = vcmp.eq.s32.totalorder %v4143_v54, 1 }
0x22a1   :  { %v3469_v18 = vpop.eup %3468 }
0x22a2   :  { %v2454_v19 = vadd.f32 1.0, %v3469_v18  ;;  %v2786_v18 = vsel %vm1211_vm6, 1.0, %v3530_v12 }
0x22a4   :  { %3470 = vrcp.f32 %v2454_v19 }
0x22ae   :  { %v3471_v20 = vpop.eup %3470 }
0x22af   :  { %v2468_v26 = vsub.f32 1.0, %v3471_v20  ;;  %v2475_v30 = vmul.f32 %v3471_v20, %v2304_v6 }
0x2305   :  { %v2459_v22 = vpop.permute.xlu0 %2458 }
0x2306   :  { %v2461_v23 = vmul.f32 %v3471_v20, %v2459_v22 }
0x2308   :  { %2463 = vrot.lane.b32.xlu1 %v2461_v23, %s3531_s26 }
0x237a   :  { %v2464_v11 = vpop.permute.xlu1 %2463 }
0x237b   :  { %v2466_v24 = vadd.f32 %v2464_v11, %v3961_v17 }
0x237d   :  { %3472 = vtanh.f32 %v2466_v24 }
0x2387   :  { %v3473_v25 = vpop.eup %3472 }
0x2388   :  { %2470 = vrot.lane.b32.xlu0 %v3473_v25, %s3532_s8  ;;  %v1248_v25 = vmul.f32 %v3942_v0, %v3915_v29 }
0x23fa   :  { %v2471_v28 = vpop.permute.xlu0 %2470 }
0x23fb   :  { %v2473_v31 = vmul.f32 %v2471_v28, %v2468_v26 }
0x23fd   :  { %v2476_v32 = vadd.f32 %v2475_v30, %v2473_v31  ;;  %v1249_v30 = vsel %vm1190_vm4, %v1248_v25, 0.0 }
0x23ff   :  { %2478 = vrot.lane.b32.xlu1 %v2476_v32, %s3532_s8  ;;  %v2649_v51 = vrot.slane %v2476_v32, 6 }
0x2471   :  { %v2479_v34 = vpop.permute.xlu1 %2478 }
0x2472   :  { %3204 = vmatmul.mubr.msk.f32.vlgmr.msra.gmra.mrb[24].mxu1 %vm264_vm2, %v2479_v34  ;;  %3215 = vmatmul.mubr.msk.f32.vlgmr.msra.gmra.mrb[24].mxu0 %vm264_vm2, %v2479_v34 }
0x2473   :  { %3384 = vmatpush3.bf16.msra.mxu1 %v3978_v33  ;;  %3225 = vmatprep.mubr.msk.f32.mxu1 %vm3529_vm1, %v3530_v12 }
0x2474   :  { %3385 = vmatprep.subr.bf16.mxu1 %v3528_v8 }
0x2477   :  { %3387 = vmatpush3.bf16.msra.mxu1 %v3984_v35 }
0x2545   :  { %v2548_v36 = vpop.f32.mrb[24].mxu1  ;;  %v2619_v37 = vpop.f32.mrb[24].mxu0 }
0x2546   :  { %v2549_v38 = vadd.f32 %v4008_v44, %v2548_v36  ;;  %v2620_v39 = vadd.f32 %v3954_v10, %v2619_v37  ;;  %v3205_v40 = vpop.f32.mrb[25].mxu1  ;;  %v3216_v41 = vpop.f32.mrb[25].mxu0 }
0x2548   :  { %2552 = vst.msk [vmem:[%s4221_s22 + $0x8] sm:$0x3] %vm1847_vm3, %v2549_v38  ;;  %v2624_v33 = vrot.slane %v2620_v39, 6 }
0x254a   :  { %2633 = vrot.lane.b32.xlu0 %v2624_v33, %s3531_s26  ;;  %v2626_v8 = vadd.f32 %v2624_v33, %v3961_v17 }
0x254c   :  { %v2824_v42 = vmul.f32 -1.442695, %v2626_v8 }
0x254e   :  { %3474 = vpow2.f32 %v2824_v42 }
0x2558   :  { %v3475_v35 = vpop.eup %3474 }
0x2559   :  { %v2630_v43 = vadd.f32 1.0, %v3475_v35 }
0x255b   :  { %3476 = vrcp.f32 %v2630_v43 }
0x2565   :  { %v3477_v45 = vpop.eup %3476 }
0x2566   :  { %v2643_v52 = vsub.f32 1.0, %v3477_v45  ;;  %v2651_v55 = vmul.f32 %v3477_v45, %v2649_v51 }
0x25bc   :  { %v2634_v46 = vpop.permute.xlu0 %2633 }
0x25bd   :  { %v2636_v10 = vmul.f32 %v3477_v45, %v2634_v46 }
0x25bf   :  { %2638 = vrot.lane.b32.xlu1 %v2636_v10, %s3531_s26 }
0x2631   :  { %v2639_v47 = vpop.permute.xlu1 %2638 }
0x2632   :  { %v2641_v48 = vadd.f32 %v2639_v47, %v3961_v17 }
0x2634   :  { %3478 = vtanh.f32 %v2641_v48 }
0x263e   :  { %v3479_v49 = vpop.eup %3478 }
0x263f   :  { %2645 = vrot.lane.b32.xlu0 %v3479_v49, %s3532_s8 }
0x2643   :  { %1200 = vrot.lane.b32.xlu0 %v3915_v29, %s3533_s17 }
0x2647   :  { %1232 = vrot.lane.b32.xlu0 %v3915_v29, %s3532_s8 }
0x26b1   :  { %v2646_v53 = vpop.permute.xlu0 %2645 }
0x26b2   :  { %v2648_v56 = vmul.f32 %v2646_v53, %v2643_v52 }
0x26b4   :  { %v2652_v57 = vadd.f32 %v2651_v55, %v2648_v56 }
0x26b5   :  { %v1201_v58 = vpop.permute.xlu0 %1200 }
0x26b6   :  { %v2654_v59 = vrot.slane %v2652_v57, 2  ;;  %v1203_v17 = vmul.f32 %v1201_v58, %v3940_v62  ;;  %v1257_v60 = vmul.f32 %v1201_v58, %v3942_v0 }
0x26b8   :  { %2655 = vrot.lane.b32.xlu1 %v2654_v59, %s3532_s8  ;;  %1205 = vrot.lane.b32.xlu0 %v1203_v17, %s3532_s8 }
0x26b9   :  { %v1233_v1 = vpop.permute.xlu0 %1232 }
0x26ba   :  { %v1235_v9 = vmul.f32 %v1233_v1, %v3940_v62  ;;  %v1283_v7 = vmul.f32 %v1233_v1, %v3942_v0 }
0x26bc   :  { %1216 = vrot.lane.b32.xlu1 %v3915_v29, %s3531_s26 }
0x26e0   :  { %1192 = vadd.xlane.f32.xlu1 %v1191_v63 }
0x272a   :  { %v2656_v2 = vpop.permute.xlu1 %2655  ;;  %v1206_v3 = vpop.permute.xlu0 %1205 }
0x272b   :  { %3226 = vmatmul.mubr.msk.f32.vlgmr.msra.gmra.mrb[26].mxu1 %vm264_vm2, %v2656_v2  ;;  %v1208_v4 = vsel %vm1190_vm4, %v1206_v3, 0.0 }
0x272c   :  { %1209 = vadd.xlane.f32.xlu0 %v1208_v4 }
0x272e   :  { %v1217_v5 = vpop.permute.xlu1 %1216 }
0x272f   :  { %v1219_v21 = vmul.f32 %v1217_v5, %v3940_v62  ;;  %v1270_v6 = vmul.f32 %v1217_v5, %v3942_v0  ;;  %v2785_v62 = vsel %vm1194_vm5, 1.0, %v3530_v12 }
0x2731   :  { %1221 = vrot.lane.b32.xlu1 %v1219_v21, %s3531_s26 }
0x2735   :  { %1259 = vrot.lane.b32.xlu1 %v1257_v60, %s3532_s8 }
0x2739   :  { %1272 = vrot.lane.b32.xlu1 %v1270_v6, %s3531_s26  ;;  %s3534_s26 = smov [#allocation4]  }
0x273a   :  { %s2746_s8 = sshll.u32 %s3534_s26, 4  ;;  %s2747_s8 = int_to_ptr.vmem [resolvable:$true] %s2746_s8 }
0x273b   :  { %s3480_s14 = scalar_lea.vmem %s2747_s8, 32  ;;  %p3485_p1 = scmp.lt.s32.totalorder %s2747_s8, %s2747_s8 }
0x273c   :  { %p3481_p0 = scmp.ne.s32.totalorder %s2747_s8, %s3480_s14  ;;  %p3486_p2 = scmp.lt.s32.totalorder %s3480_s14, %s3480_s14 }
0x273e   :  { %p3487_p3 = por %p3486_p2, %p3485_p1 }
0x2740   :  { %p3488_p4 = pnand %p3487_p3, %p3481_p0 }
0x2742   :  { %1237 = vrot.lane.b32.xlu0 %v1235_v9, %s3533_s17 }
0x2746   :  { %1285 = vrot.lane.b32.xlu0 %v1283_v7, %s3533_s17 }
0x276d   :  { %v1193_v13 = vpop.xlane.xlu1 %1192 }
0x276e   :  { %v1197_v20 = vmul.f32 %v2785_v62, %v1193_v13 }
0x27a3   :  { %v1222_v50 = vpop.permute.xlu1 %1221 }
0x27a4   :  { %v1224_v27 = vsel %vm1190_vm4, %v1222_v50, 0.0 }
0x27a5   :  { %1225 = vadd.xlane.f32.xlu1 %v1224_v27 }
0x27a7   :  { %v1260_v14 = vpop.permute.xlu1 %1259 }
0x27a8   :  { %v1262_v15 = vsel %vm1190_vm4, %v1260_v14, 0.0 }
0x27a9   :  { %1263 = vadd.xlane.f32.xlu1 %v1262_v15 }
0x27ab   :  { %v1273_v31 = vpop.permute.xlu1 %1272 }
0x27ac   :  { %v1275_v32 = vsel %vm1190_vm4, %v1273_v31, 0.0 }
0x27b9   :  { %v1210_v19 = vpop.xlane.xlu0 %1209 }
0x27ba   :  { %v1214_v22 = vmul.f32 %v2786_v18, %v1210_v19 }
0x27bc   :  { %v1215_v23 = vadd.f32 %v1214_v22, %v1197_v20 }
0x27bd   :  { %v1238_v11 = vpop.permute.xlu0 %1237 }
0x27be   :  { %v1240_v24 = vsel %vm1190_vm4, %v1238_v11, 0.0 }
0x27bf   :  { %1241 = vadd.xlane.f32.xlu0 %v1240_v24 }
0x27c1   :  { %v1286_v26 = vpop.permute.xlu0 %1285 }
0x27c2   :  { %v1288_v28 = vsel %vm1190_vm4, %v1286_v26, 0.0 }
0x27c3   :  { %1289 = vadd.xlane.f32.xlu1 %v1288_v28  ;;  %1250 = vadd.xlane.f32.xlu0 %v1249_v30 }
0x27c7   :  { %1276 = vadd.xlane.f32.xlu0 %v1275_v32 }
0x27c8   :  { %3491 = shalt.err (!%p3488_p4)
}
0x27c9   :  { %s3492_s6 = scalar_lea.hbm %s4220_s21, 32 }
0x27ca   :  { %p3493_p5 = scmp.ne.s32.totalorder %s4220_s21, %s3492_s6  ;;  %p3496_p6 = scmp.lt.u32.totalorder %s3492_s6, %s4220_s21 }
0x27cc   :  { %p3498_p7 = pnand %p3496_p6, %p3493_p5 }
0x27ce   :  { %3501 = shalt.err (!%p3498_p7)
}
0x27cf   :  { %2749 = dma.vmem_to_hbm [thread:$0]  %s2747_s8, 32, %s4220_s21, [#allocation5]   ;;  %vm1227_vm7 = vcmp.eq.s32.totalorder %v4143_v54, 2  ;;  %vm1243_vm8 = vcmp.eq.s32.totalorder %v4143_v54, 3  ;;  %vm1252_vm9 = vcmp.eq.s32.totalorder %v4143_v54, 4  ;;  %vm1265_vm10 = vcmp.eq.s32.totalorder %v4143_v54, 5 }
0x27d0   :  { %v2787_v36 = vsel %vm1227_vm7, 1.0, %v3530_v12  ;;  %v2788_v38 = vsel %vm1243_vm8, 1.0, %v3530_v12  ;;  %v2789_v41 = vsel %vm1252_vm9, 1.0, %v3530_v12  ;;  %vm1278_vm11 = vcmp.eq.s32.totalorder %v4143_v54, 6  ;;  %v2793_v57 = vld [vmem:[%s4210_s11] ss:$0 sm:$0xff] }
0x27d1   :  { %v2790_v8 = vsel %vm1265_vm10, 1.0, %v3530_v12  ;;  %vm1291_vm12 = vcmp.eq.s32.totalorder %v4143_v54, 7  ;;  %v2791_v46 = vsel %vm1278_vm11, 1.0, %v3530_v12  ;;  %s3535_s3 = smov [#allocation2]   ;;  %vm1304_vm13 = vcmask 58368  }
0x27d2   :  { %v2792_v48 = vsel %vm1291_vm12, 1.0, %v3530_v12  ;;  %s2736_s18 = sshll.u32 %s3535_s3, 4  ;;  %s2737_s18 = int_to_ptr.vmem [resolvable:$true] %s2736_s18 }
0x27d3   :  { %s3502_s15 = scalar_lea.vmem %s2737_s18, 32  ;;  %p3507_p9 = scmp.lt.s32.totalorder %s2737_s18, %s2737_s18 }
0x27d4   :  { %p3503_p8 = scmp.ne.s32.totalorder %s2737_s18, %s3502_s15  ;;  %p3508_p10 = scmp.lt.s32.totalorder %s3502_s15, %s3502_s15 }
0x27d6   :  { %p3509_p11 = por %p3508_p10, %p3507_p9 }
0x27d8   :  { %p3510_p12 = pnand %p3509_p11, %p3503_p8 }
0x27fe   :  { %v2725_v29 = vpop.f32.mrb[26].mxu1 }
0x27ff   :  { %v2726_v0 = vadd.f32 %v4008_v44, %v2725_v29  ;;  %v3227_v34 = vpop.f32.mrb[27].mxu1 }
0x2801   :  { %2729 = vst.msk [vmem:[%s4221_s22 + $0xa] sm:$0x3] %vm1847_vm3, %v2726_v0 }
0x2832   :  { %v1226_v37 = vpop.xlane.xlu1 %1225 }
0x2833   :  { %v1230_v39 = vmul.f32 %v2787_v36, %v1226_v37 }
0x2835   :  { %v1231_v33 = vadd.f32 %v1230_v39, %v1215_v23 }
0x2836   :  { %v1264_v42 = vpop.xlane.xlu1 %1263 }
0x2837   :  { %v1268_v10 = vmul.f32 %v2790_v8, %v1264_v42 }
0x284c   :  { %v1242_v40 = vpop.xlane.xlu0 %1241 }
0x284d   :  { %v1246_v44 = vmul.f32 %v2788_v38, %v1242_v40 }
0x284f   :  { %v1247_v43 = vadd.f32 %v1246_v44, %v1231_v33 }
0x2850   :  { %v1251_v35 = vpop.xlane.xlu0 %1250  ;;  %v1290_v49 = vpop.xlane.xlu1 %1289 }
0x2851   :  { %v1255_v45 = vmul.f32 %v2789_v41, %v1251_v35  ;;  %v1294_v55 = vmul.f32 %v2792_v48, %v1290_v49 }
0x2853   :  { %v1256_v47 = vadd.f32 %v1255_v45, %v1247_v43 }
0x2854   :  { %v1277_v51 = vpop.xlane.xlu0 %1276 }
0x2855   :  { %v1269_v52 = vadd.f32 %v1268_v10, %v1256_v47  ;;  %v1281_v53 = vmul.f32 %v2791_v46, %v1277_v51 }
0x2857   :  { %v1282_v56 = vadd.f32 %v1281_v53, %v1269_v52 }
0x2859   :  { %v1295_v58 = vadd.f32 %v1294_v55, %v1282_v56 }
0x285b   :  { %v1303_v59 = vadd.f32 %v2793_v57, %v1295_v58 }
0x285d   :  { %1305 = vst.msk [vmem:[#allocation2] sm:$0x3] %vm1304_vm13, %v1303_v59 }
0x285e   :  { %3513 = shalt.err (!%p3510_p12)
}
0x285f   :  { %s3514_s19 = scalar_lea.hbm %s4219_s20, 32 }
0x2860   :  { %p3515_p13 = scmp.ne.s32.totalorder %s4219_s20, %s3514_s19  ;;  %p3518_p0 = scmp.lt.u32.totalorder %s3514_s19, %s4219_s20 }
0x2862   :  { %p3520_p1 = pnand %p3518_p0, %p3515_p13 }
0x2864   :  { %3523 = shalt.err (!%p3520_p1)
}
0x2865   :  { %2739 = dma.vmem_to_hbm [thread:$0]  %s2737_s18, 32, %s4219_s20, [#allocation3]  }
0x2866   :  { %3524 = dma.done.wait [#allocation3], 32  }
0x2867   :  { %3525 = vsyncadd [#allocation3], 4294967264 }
0x2868   :  { %3526 = dma.done.wait [#allocation5], 32  }
0x2869   :  { %3527 = vsyncadd [#allocation5], 4294967264 }
0x286a   :  { %2760 = vsyncpa [#allocation3], 1 }
0x286b   :  { %2761 = vsyncpa [#allocation5], 1 }

</bundles_post_ra>
